<compile_context>
chip_gen: v7x
topology: tpu7x:2x2x1
jax: 0.10.0
libtpu: 0.0.40
codegen_flags: <defaults>
</compile_context>

<pallas_src>
import functools

import jax
import jax.numpy as jnp
from jax import lax
from jax.experimental import pallas as pl
from jax.experimental.pallas import tpu as pltpu


def _round_up(x, m):
    return (x + m - 1) // m * m


def _cdiv(a, b):
    return (a + b - 1) // b


def _vmem_capacity_bytes():
    # Per-TensorCore VMEM; 64 MiB fallback is safe on every current generation (v7x floor).
    try:
        return int(pltpu.get_tpu_info().vmem_capacity_bytes)
    except Exception:
        return 64 << 20


def _fc_layer_kernel(x_ref, w_ref, b_ref, gamma_ref, beta_ref, o_ref, acc_ref, *,
                     eps, d_out_true, approx_gelu):
    k = pl.program_id(1)

    @pl.when(k == 0)
    def _():
        acc_ref[...] = jnp.zeros_like(acc_ref)

    # Cast activations to the MXU dtype in-kernel (avoids a standalone HBM cast pass).
    xk = x_ref[...].astype(w_ref.dtype)
    acc_ref[...] += jnp.dot(xk, w_ref[...], preferred_element_type=jnp.float32)

    @pl.when(k == pl.num_programs(1) - 1)
    def _():
        y = acc_ref[...] + b_ref[...]                          # (tile_m, d_out_p) f32

        if approx_gelu:
            # tanh-approx GELU -> EUP (otherwise-idle VLIW slot).
            c0 = jnp.float32(0.7978845608028654)               # sqrt(2/pi)
            y = 0.5 * y * (1.0 + jnp.tanh(c0 * (y + jnp.float32(0.044715) * y * y * y)))
        else:
            # Exact erf GELU: matches torch.nn.functional.gelu / ACT2FN['gelu'].
            y = 0.5 * y * (1.0 + lax.erf(y * jnp.float32(0.7071067811865476)))

        # Single-pass LayerNorm statistics (sum & sum-of-squares). Padded d_out lanes hold
        # exact zeros, so dividing by the true width keeps the statistics correct; padded
        # rows (ragged M) produce finite garbage that is sliced away in the wrapper.
        inv_n = jnp.float32(1.0 / d_out_true)
        s1 = jnp.sum(y, axis=-1, keepdims=True)
        s2 = jnp.sum(y * y, axis=-1, keepdims=True)
        mean = s1 * inv_n
        var = jnp.maximum(s2 * inv_n - mean * mean, 0.0)
        y_norm = (y - mean) * lax.rsqrt(var + jnp.float32(eps))   # rsqrt -> EUP, no divide

        # Dropout: identity at inference time.
        o_ref[...] = (y_norm * gamma_ref[...] + beta_ref[...]).astype(o_ref.dtype)


def fully_connected_layer(x, w_t, b, gamma, beta, *, eps=1e-12, out_dtype=None,
                          matmul_dtype=jnp.bfloat16, approx_gelu=False):
    """x: [..., D_in]; w_t: [D_in, D_out] (nn.Linear weight transposed); b/gamma/beta: [D_out]."""
    orig_shape = x.shape
    d_in = orig_shape[-1]
    d_out = w_t.shape[1]
    out_dtype = x.dtype if out_dtype is None else out_dtype

    x2 = x.reshape(-1, d_in)
    m = x2.shape[0]

    # ---- lane padding for dense (unmasked) loads/stores ----
    d_in_p = _round_up(d_in, 128)
    d_out_p = _round_up(d_out, 128)

    w_isz = jnp.dtype(matmul_dtype).itemsize
    x_isz = jnp.dtype(x.dtype).itemsize
    out_isz = jnp.dtype(out_dtype).itemsize

    # ---- VMEM-driven tiling (generation-aware) ----
    vmem_cap = _vmem_capacity_bytes()
    budget = int(0.75 * vmem_cap)            # headroom for compiler temporaries / spills

    w_bytes = d_in_p * d_out_p * w_isz
    if 2 * w_bytes <= budget // 2:
        # Weight fits comfortably: single K slab -> constant index map -> DMA'd once.
        n_k = 1
        tile_k = d_in_p
    else:
        # Stream the weight in K slabs (v7x / very large hidden sizes).
        slab_budget = budget // 3
        tile_k_cap = max(128, (slab_budget // (2 * d_out_p * w_isz)) // 128 * 128)
        n_k = _cdiv(d_in_p, min(tile_k_cap, d_in_p))
        tile_k = _round_up(_cdiv(d_in_p, n_k), 128)
        d_in_p = n_k * tile_k

    fixed_bytes = (2 * tile_k * d_out_p * w_isz      # weight slab (double buffer)
                   + 6 * d_out_p * 4)                # bias / gamma / beta (double buffer)
    per_row_bytes = (2 * tile_k * x_isz              # x tile (double buffer)
                     + 2 * d_out_p * out_isz         # out tile (double buffer)
                     + d_out_p * 4                   # f32 accumulator scratch
                     + 3 * d_out_p * 4)              # f32 epilogue temporaries headroom
    tile_m_cap = max(8, min(512, (budget - fixed_bytes) // per_row_bytes))

    # Row tiling: respect the VMEM cap, encourage >= 4 grid steps (megacore sharding +
    # pipeline overlap), and even the tiles out so padding waste stays minimal.
    n_m = _cdiv(m, tile_m_cap)
    n_m = max(n_m, min(4, _cdiv(m, 8)))
    tile_m = _round_up(_cdiv(m, n_m), 8)
    n_m = _cdiv(m, tile_m)
    m_pad = n_m * tile_m

    # ---- operand preparation (only pad / cast when actually needed) ----
    if m_pad != m or d_in_p != d_in:
        x2 = jnp.pad(x2, ((0, m_pad - m), (0, d_in_p - d_in)))          # zeros: neutral

    w2 = w_t if w_t.dtype == matmul_dtype else w_t.astype(matmul_dtype)
    if d_in_p != d_in or d_out_p != d_out:
        w2 = jnp.pad(w2, ((0, d_in_p - d_in), (0, d_out_p - d_out)))    # zeros: neutral

    def _vec(v):
        v = v if v.dtype == jnp.float32 else v.astype(jnp.float32)
        if d_out_p != d_out:
            v = jnp.pad(v, ((0, d_out_p - d_out),))
        return v.reshape(1, d_out_p)

    b2, g2, be2 = _vec(b), _vec(gamma), _vec(beta)

    grid = (n_m, n_k)
    vmem_limit = int(min(max(fixed_bytes + tile_m * per_row_bytes + (4 << 20), 16 << 20),
                         int(0.9 * vmem_cap)))

    w_reads = 1 if n_k == 1 else n_m          # streamed weight is re-fetched per M tile
    cost = pl.CostEstimate(
        flops=2 * m_pad * d_in_p * d_out_p,
        transcendentals=m_pad * d_out_p,      # erf/tanh (+ rsqrt noise)
        bytes_accessed=(m_pad * d_in_p * x_isz
                        + w_reads * d_in_p * d_out_p * w_isz
                        + m_pad * d_out_p * out_isz),
    )

    kernel = functools.partial(_fc_layer_kernel, eps=float(eps), d_out_true=d_out,
                               approx_gelu=approx_gelu)

    out = pl.pallas_call(
        kernel,
        out_shape=jax.ShapeDtypeStruct((m_pad, d_out_p), out_dtype),
        grid_spec=pltpu.PrefetchScalarGridSpec(
            num_scalar_prefetch=0,
            grid=grid,
            in_specs=[
                pl.BlockSpec((tile_m, tile_k), lambda i, k: (i, k)),    # x tile
                pl.BlockSpec((tile_k, d_out_p), lambda i, k: (k, 0)),   # weight slab
                pl.BlockSpec((1, d_out_p), lambda i, k: (0, 0)),        # bias
                pl.BlockSpec((1, d_out_p), lambda i, k: (0, 0)),        # LN gamma
                pl.BlockSpec((1, d_out_p), lambda i, k: (0, 0)),        # LN beta
            ],
            out_specs=pl.BlockSpec((tile_m, d_out_p), lambda i, k: (i, 0)),
            scratch_shapes=[pltpu.VMEM((tile_m, d_out_p), jnp.float32)],
        ),
        compiler_params=pltpu.CompilerParams(
            dimension_semantics=("parallel", "arbitrary"),
            vmem_limit_bytes=vmem_limit,
        ),
        cost_estimate=cost,
    )(x2, w2, b2, g2, be2)

    if m_pad != m or d_out_p != d_out:
        out = out[:m, :d_out]
    return out.reshape(orig_shape[:-1] + (d_out,))


def _reference(x, w_t, b, gamma, beta, eps=1e-12, matmul_dtype=jnp.bfloat16):
    # Same bf16-input / f32-accumulate matmul as the kernel, f32 epilogue, exact-erf GELU.
    d_in = x.shape[-1]
    d_out = w_t.shape[1]
    y = jnp.dot(x.reshape(-1, d_in).astype(matmul_dtype), w_t.astype(matmul_dtype),
                preferred_element_type=jnp.float32)
    y = y.reshape(x.shape[:-1] + (d_out,)) + b.astype(jnp.float32)
    y = 0.5 * y * (1.0 + lax.erf(y * jnp.float32(0.7071067811865476)))
    mean = jnp.mean(y, axis=-1, keepdims=True)
    var = jnp.mean((y - mean) ** 2, axis=-1, keepdims=True)
    yn = (y - mean) / jnp.sqrt(var + jnp.float32(eps))
    return yn * gamma.astype(jnp.float32) + beta.astype(jnp.float32)


if __name__ == "__main__":
    # Small shapes consistent with the module: NeuralConfig hidden size 768 (lane-aligned).
    batch, seq, d_in, d_out = 2, 8, 768, 768
    eps = 1e-12

    key = jax.random.PRNGKey(0)
    kx, kw, kb, kg, kbt = jax.random.split(key, 5)

    x = jax.random.normal(kx, (batch, seq, d_in), dtype=jnp.float32)
    # nn.Linear weight is [out, in]; store pre-transposed as [in, out] for the kernel.
    w_t = jax.random.normal(kw, (d_in, d_out), dtype=jnp.float32) * (1.0 / jnp.sqrt(d_in))
    b = jax.random.normal(kb, (d_out,), dtype=jnp.float32) * 0.02
    gamma = 1.0 + 0.1 * jax.random.normal(kg, (d_out,), dtype=jnp.float32)
    beta = 0.1 * jax.random.normal(kbt, (d_out,), dtype=jnp.float32)

    # Pre-convert the persistent weight once (avoids a per-call HBM cast pass).
    w_bf16 = w_t.astype(jnp.bfloat16)

    out = fully_connected_layer(x, w_bf16, b, gamma, beta, eps=eps)
    out = jax.block_until_ready(out)

    ref = _reference(x, w_t, b, gamma, beta, eps=eps)
    assert out.shape == (batch, seq, d_out)
    assert jnp.allclose(out, ref, atol=5e-3, rtol=5e-3), "mismatch vs reference"

    print("KERNEL_OK")
</pallas_src>

<mosaic_0001>
module attributes {stable_mosaic.version = 11 : i64} {
  func.func @_fc_layer_kernel(%arg0: i32, %arg1: i32, %arg2: memref<8x768xf32, #tpu.memory_space<vmem>>, %arg3: memref<768x768xbf16, #tpu.memory_space<vmem>>, %arg4: memref<1x768xf32, #tpu.memory_space<vmem>>, %arg5: memref<1x768xf32, #tpu.memory_space<vmem>>, %arg6: memref<1x768xf32, #tpu.memory_space<vmem>>, %arg7: memref<8x768xf32, #tpu.memory_space<vmem>>, %arg8: memref<8x768xf32, #tpu.memory_space<vmem>>) attributes {dimension_semantics = [#tpu.dimension_semantics<parallel>, #tpu.dimension_semantics<arbitrary>], iteration_bounds = array<i64: 2, 1>, scalar_prefetch = 0 : i64, scratch_operands = 1 : i64, tpu.core_type = #tpu.core_type<tc>, window_params = [{transform_indices = @transform_0, window_bounds = array<i64: 8, 768>}, {transform_indices = @transform_1, window_bounds = array<i64: 768, 768>}, {pipeline_mode = #tpu.pipeline_mode<synchronous>, transform_indices = @transform_2, window_bounds = array<i64: 1, 768>}, {pipeline_mode = #tpu.pipeline_mode<synchronous>, transform_indices = @transform_3, window_bounds = array<i64: 1, 768>}, {pipeline_mode = #tpu.pipeline_mode<synchronous>, transform_indices = @transform_4, window_bounds = array<i64: 1, 768>}, {transform_indices = @transform_5, window_bounds = array<i64: 8, 768>}]} {
    %c0_i32 = arith.constant 0 : i32
    %0 = arith.cmpi eq, %arg1, %c0_i32 : i32
    %1 = arith.extui %0 : i1 to i32
    %c0_i32_0 = arith.constant 0 : i32
    %2 = arith.cmpi ne, %1, %c0_i32_0 : i32
    scf.if %2 {
      %cst_10 = arith.constant 0.000000e+00 : f32
      %13 = vector.broadcast %cst_10 : f32 to vector<8x768xf32>
      %c0_11 = arith.constant 0 : index
      %c0_12 = arith.constant 0 : index
      %14 = vector.load %arg8[%c0_11, %c0_12] : memref<8x768xf32, #tpu.memory_space<vmem>>, vector<8x768xf32>
      tpu.vector_store %arg8[%c0_11, %c0_12], %13 {strides = array<i32>} : memref<8x768xf32, #tpu.memory_space<vmem>>, vector<8x768xf32>,
    } else {
    }
    %c0 = arith.constant 0 : index
    %c0_1 = arith.constant 0 : index
    %3 = vector.load %arg2[%c0, %c0_1] : memref<8x768xf32, #tpu.memory_space<vmem>>, vector<8x768xf32>
    %4 = arith.truncf %3 : vector<8x768xf32> to vector<8x768xbf16>
    %c0_2 = arith.constant 0 : index
    %c0_3 = arith.constant 0 : index
    %5 = vector.load %arg8[%c0_2, %c0_3] : memref<8x768xf32, #tpu.memory_space<vmem>>, vector<8x768xf32>
    %c0_4 = arith.constant 0 : index
    %c0_5 = arith.constant 0 : index
    %6 = vector.load %arg3[%c0_4, %c0_5] : memref<768x768xbf16, #tpu.memory_space<vmem>>, vector<768x768xbf16>
    %cst = arith.constant dense<0.000000e+00> : vector<8x768xf32>
    %7 = tpu.matmul %4, %6, %cst {dimension_numbers = #tpu.dot_dimension_numbers<[1], [0], [0], [1], [0, 0, 1, 1], [], []>} : vector<8x768xbf16>, vector<768x768xbf16>, vector<8x768xf32> -> vector<8x768xf32>
    %8 = arith.addf %5, %7 : vector<8x768xf32>
    %c0_6 = arith.constant 0 : index
    %c0_7 = arith.constant 0 : index
    %9 = vector.load %arg8[%c0_6, %c0_7] : memref<8x768xf32, #tpu.memory_space<vmem>>, vector<8x768xf32>
    tpu.vector_store %arg8[%c0_6, %c0_7], %8 {strides = array<i32>} : memref<8x768xf32, #tpu.memory_space<vmem>>, vector<8x768xf32>,
    %c0_i32_8 = arith.constant 0 : i32
    %10 = arith.cmpi eq, %arg1, %c0_i32_8 : i32
    %11 = arith.extui %10 : i1 to i32
    %c0_i32_9 = arith.constant 0 : i32
    %12 = arith.cmpi ne, %11, %c0_i32_9 : i32
    scf.if %12 {
      %c0_10 = arith.constant 0 : index
      %c0_11 = arith.constant 0 : index
      %13 = vector.load %arg8[%c0_10, %c0_11] : memref<8x768xf32, #tpu.memory_space<vmem>>, vector<8x768xf32>
      %c0_12 = arith.constant 0 : index
      %c0_13 = arith.constant 0 : index
      %14 = vector.load %arg4[%c0_12, %c0_13] : memref<1x768xf32, #tpu.memory_space<vmem>>, vector<1x768xf32>
      %15 = vector.broadcast %14 : vector<1x768xf32> to vector<8x768xf32>
      %16 = arith.addf %13, %15 : vector<8x768xf32>
      %cst_14 = arith.constant 5.000000e-01 : f32
      %17 = vector.broadcast %cst_14 : f32 to vector<8x768xf32>
      %18 = arith.mulf %17, %16 : vector<8x768xf32>
      %cst_15 = arith.constant 0.707106769 : f32
      %19 = vector.broadcast %cst_15 : f32 to vector<8x768xf32>
      %20 = arith.mulf %16, %19 : vector<8x768xf32>
      %21 = math.erf %20 : vector<8x768xf32>
      %cst_16 = arith.constant 1.000000e+00 : f32
      %22 = vector.broadcast %cst_16 : f32 to vector<8x768xf32>
      %23 = arith.addf %22, %21 : vector<8x768xf32>
      %24 = arith.mulf %18, %23 : vector<8x768xf32>
      %cst_17 = arith.constant dense<0.000000e+00> : vector<8xf32>
      %25 = vector.multi_reduction <add>, %24, %cst_17 [1] : vector<8x768xf32> to vector<8xf32>
      %26 = vector.shape_cast %25 : vector<8xf32> to vector<8x1xf32>
      %27 = arith.mulf %24, %24 : vector<8x768xf32>
      %cst_18 = arith.constant dense<0.000000e+00> : vector<8xf32>
      %28 = vector.multi_reduction <add>, %27, %cst_18 [1] : vector<8x768xf32> to vector<8xf32>
      %29 = vector.shape_cast %28 : vector<8xf32> to vector<8x1xf32>
      %cst_19 = arith.constant 0.00130208337 : f32
      %30 = vector.broadcast %cst_19 : f32 to vector<8x1xf32>
      %31 = arith.mulf %26, %30 : vector<8x1xf32>
      %cst_20 = arith.constant 0.00130208337 : f32
      %32 = vector.broadcast %cst_20 : f32 to vector<8x1xf32>
      %33 = arith.mulf %29, %32 : vector<8x1xf32>
      %34 = arith.mulf %31, %31 : vector<8x1xf32>
      %35 = arith.subf %33, %34 : vector<8x1xf32>
      %cst_21 = arith.constant 0.000000e+00 : f32
      %36 = vector.broadcast %cst_21 : f32 to vector<8x1xf32>
      %37 = arith.maximumf %35, %36 : vector<8x1xf32>
      %38 = vector.broadcast %31 : vector<8x1xf32> to vector<8x768xf32>
      %39 = arith.subf %24, %38 : vector<8x768xf32>
      %cst_22 = arith.constant 9.99999996E-13 : f32
      %40 = vector.broadcast %cst_22 : f32 to vector<8x1xf32>
      %41 = arith.addf %37, %40 : vector<8x1xf32>
      %42 = math.rsqrt %41 : vector<8x1xf32>
      %43 = vector.broadcast %42 : vector<8x1xf32> to vector<8x768xf32>
      %44 = arith.mulf %39, %43 : vector<8x768xf32>
      %c0_23 = arith.constant 0 : index
      %c0_24 = arith.constant 0 : index
      %45 = vector.load %arg5[%c0_23, %c0_24] : memref<1x768xf32, #tpu.memory_space<vmem>>, vector<1x768xf32>
      %46 = vector.broadcast %45 : vector<1x768xf32> to vector<8x768xf32>
      %47 = arith.mulf %44, %46 : vector<8x768xf32>
      %c0_25 = arith.constant 0 : index
      %c0_26 = arith.constant 0 : index
      %48 = vector.load %arg6[%c0_25, %c0_26] : memref<1x768xf32, #tpu.memory_space<vmem>>, vector<1x768xf32>
      %49 = vector.broadcast %48 : vector<1x768xf32> to vector<8x768xf32>
      %50 = arith.addf %47, %49 : vector<8x768xf32>
      %c0_27 = arith.constant 0 : index
      %c0_28 = arith.constant 0 : index
      %51 = vector.load %arg7[%c0_27, %c0_28] : memref<8x768xf32, #tpu.memory_space<vmem>>, vector<8x768xf32>
      tpu.vector_store %arg7[%c0_27, %c0_28], %50 {strides = array<i32>} : memref<8x768xf32, #tpu.memory_space<vmem>>, vector<8x768xf32>,
    } else {
    }
    return
  }
  func.func @transform_0(%arg0: i32, %arg1: i32) -> (i32, i32) {
    %c0_i32 = arith.constant 0 : i32
    return %arg0, %arg1 : i32, i32
  }
  func.func @transform_1(%arg0: i32, %arg1: i32) -> (i32, i32) {
    %c0_i32 = arith.constant 0 : i32
    %c0_i32_0 = arith.constant 0 : i32
    return %arg1, %c0_i32 : i32, i32
  }
  func.func @transform_2(%arg0: i32, %arg1: i32) -> (i32, i32) {
    %c0_i32 = arith.constant 0 : i32
    %c0_i32_0 = arith.constant 0 : i32
    %c0_i32_1 = arith.constant 0 : i32
    return %c0_i32, %c0_i32_0 : i32, i32
  }
  func.func @transform_3(%arg0: i32, %arg1: i32) -> (i32, i32) {
    %c0_i32 = arith.constant 0 : i32
    %c0_i32_0 = arith.constant 0 : i32
    %c0_i32_1 = arith.constant 0 : i32
    return %c0_i32, %c0_i32_0 : i32, i32
  }
  func.func @transform_4(%arg0: i32, %arg1: i32) -> (i32, i32) {
    %c0_i32 = arith.constant 0 : i32
    %c0_i32_0 = arith.constant 0 : i32
    %c0_i32_1 = arith.constant 0 : i32
    return %c0_i32, %c0_i32_0 : i32, i32
  }
  func.func @transform_5(%arg0: i32, %arg1: i32) -> (i32, i32) {
    %c0_i32 = arith.constant 0 : i32
    %c0_i32_0 = arith.constant 0 : i32
    return %arg0, %c0_i32 : i32, i32
  }
}

</mosaic_0001>

<bundles_post_ra>
// kernel: tpu_custom_call.1
= control target key start
LH: loop header
LB: loop body
LE: loop exit
PB: predicated region body
PF: predicated region fallthrough
CT: control target
= control target key end

     0   :  { %s4302_s0 = inlined_call_operand.hbm [shape: f32[16,768], index: 0, kind: input, shape index: {}]   ;;  %s4303_s1 = inlined_call_operand.hbm [shape: bf16[768,768], index: 1, kind: input, shape index: {}]   ;;  %s4304_s2 = inlined_call_operand.hbm [shape: f32[1,768], index: 2, kind: input, shape index: {}]   ;;  %s4305_s3 = inlined_call_operand.hbm [shape: f32[1,768], index: 3, kind: input, shape index: {}]   ;;  %s4306_s4 = inlined_call_operand.hbm [shape: f32[1,768], index: 4, kind: input, shape index: {}]   ;;  %s4307_s5 = inlined_call_operand.hbm [shape: f32[16,768], index: 5, kind: output, shape index: {}]  }
   0x1   :  { %4312 = sst [smem:[#allocation17_spill]] %s4303_s1 }
   0x2   :  { %10 = vsyncpa [#allocation4], 0 }
   0x3   :  { %12 = vsyncpa [#allocation4 + $0x1], 0 }
   0x4   :  { %13 = vsyncpa [#allocation7], 0 }
   0x5   :  { %14 = vsyncpa [#allocation10], 0 }
   0x6   :  { %15 = vsyncpa [#allocation5], 0 }
   0x7   :  { %17 = vsyncpa [#allocation5 + $0x1], 0  ;;  %s3923_s18 = smov 0   ;;  %s3925_s19 = smov 0  }
   0x8   :  { %s3927_s20 = smov 0   ;;  %s3929_s21 = smov 0  }
   0x9   :  { %s3931_s22 = smov 0   ;;  %s3933_s23 = smov 0  }
   0xa LB: > { %s2791_s24 = sadd.s32 4294967295, %s3883_s23   ;;  %p2793_p0 = scmp.ge.s32.totalorder %s3883_s23, 1  ;;  %s3883_s23 = sphi %s3933_s23, %s23_s23   ;;  %s3879_s22 = sphi %s3931_s22, %s4333_s22   ;;  %s3875_s21 = sphi %s3929_s21, %s4332_s21   ;;  %s3871_s20 = sphi %s3927_s20, %s4331_s20   ;;  %s3867_s19 = sphi %s3925_s19, %s4330_s19   ;;  %s3863_s18 = sphi %s3923_s18, %s4329_s18  }
   0xb   : > { %p3957_p1 = scmp.eq.s32.totalorder %s2791_s24, 0  ;;  %p183_p2 = scmp.lt.s32.totalorder %s3883_s23, 3 }
   0xc   : > { %s3885_s27 = smov [#allocation6]   ;;  %s3886_s30 = smov [#allocation9]  }
   0xd   : > { %s4313_s25 = scalar_select %p3957_p1, 1, 0 }
   0xe   : > { %p3962_p3 = pnand %p2793_p0, %p183_p2  ;;  %s199_s28 = sshll.u32 %s3885_s27, 4  ;;  %s3966_s28 = int_to_ptr.vmem [resolvable:$true] %s199_s28 }
   0xf   : > { %s224_s6 = sshll.u32 %s3886_s30, 4  ;;  %s3887_s7 = smov [#allocation8]   ;;  %s3977_s6 = int_to_ptr.vmem [resolvable:$true] %s224_s6 }
  0x10   : > { %s4314_s26 = scalar_select %p3962_p3, 1, 0 }
  0x11   : > { %p3120_p4 = pneg %p3962_p3  ;;  %s3979_s8 = sshll.u32 %s3887_s7, 4  ;;  %s214_s8 = int_to_ptr.vmem [resolvable:$true] %s3979_s8 }
  0x12   : > { %s4316_s1 = sld [smem:[#allocation17_spill]] }
  0x13   : > { %p3973_p6 = pnand %p3120_p4, %p3957_p1 }
  0x15   : > { %p3989_p8 = pneg %p3973_p6 }
  0x18   : > { %s3651_s11 = scalar_lea.hbm %s4316_s1, 36864 }
  0x19   : > { %p3652_p7 = scmp.ne.s32.totalorder %s4316_s1, %s3651_s11  ;;  %p3658_p11 = scmp.lt.u32.totalorder %s3651_s11, %s4316_s1 }
  0x1b   : > { %p3654_p9 = pnand %p3989_p8, %p3652_p7 }
  0x1d   : > { %p3655_p10 = pneg %p3654_p9 }
  0x1f   : > { %p3660_p12 = pnand %p3658_p11, %p3655_p10 }
  0x21   : > { %3663 = shalt.err (!%p3660_p12)
}
  0x22   : > { %s3664_s17 = scalar_lea.vmem %s3966_s28, 36864  ;;  %p3672_p4 = scmp.lt.s32.totalorder %s3966_s28, %s3966_s28 }
  0x23   : > { %p3665_p13 = scmp.ne.s32.totalorder %s3966_s28, %s3664_s17  ;;  %p3673_p5 = scmp.lt.s32.totalorder %s3664_s17, %s3664_s17 }
  0x25   : > { %p3667_p0 = pnand %p3665_p13, %p3989_p8  ;;  %p3674_p7 = por %p3673_p5, %p3672_p4 }
  0x27   : > { %p3668_p2 = pneg %p3667_p0 }
  0x29   : > { %p3675_p9 = pnand %p3674_p7, %p3668_p2 }
  0x2b   : > { %3678 = shalt.err (!%p3675_p9)
}
  0x2c   : > { %s3888_s27 = smov 384   ;;  %s3889_s30 = smov 24  }
  0x2d   : > { %3123 = dma.hbm_to_vmem [thread:$0]  (!%p3973_p6), %s4316_s1, 36864, %s3966_s28, [#allocation7], %s3888_s27, %s3888_s27, %s3889_s30  }
  0x2e   : > { %s3679_s12 = scalar_lea.hbm %s4305_s3, 96 }
  0x2f   : > { %p3680_p5 = scmp.ne.s32.totalorder %s4305_s3, %s3679_s12  ;;  %p3686_p12 = scmp.lt.u32.totalorder %s3679_s12, %s4305_s3 }
  0x31   : > { %p3682_p10 = pnand %p3680_p5, %p3989_p8 }
  0x33   : > { %p3683_p11 = pneg %p3682_p10 }
  0x35   : > { %p3688_p13 = pnand %p3686_p12, %p3683_p11 }
  0x37   : > { %3691 = shalt.err (!%p3688_p13)
}
  0x38   : > { %s3692_s28 = scalar_lea.vmem %s3977_s6, 96  ;;  %p3700_p7 = scmp.lt.s32.totalorder %s3977_s6, %s3977_s6 }
  0x39   : > { %p3693_p0 = scmp.ne.s32.totalorder %s3977_s6, %s3692_s28  ;;  %p3701_p9 = scmp.lt.s32.totalorder %s3692_s28, %s3692_s28 }
  0x3b   : > { %p3695_p2 = pnand %p3693_p0, %p3989_p8  ;;  %p3702_p5 = por %p3701_p9, %p3700_p7 }
  0x3d   : > { %p3696_p4 = pneg %p3695_p2 }
  0x3f   : > { %p3703_p10 = pnand %p3702_p5, %p3696_p4 }
  0x41   : > { %3706 = shalt.err (!%p3703_p10)
}
  0x42   : > { %3129 = dma.hbm_to_vmem [thread:$0]  (!%p3973_p6), %s4305_s3, 96, %s3977_s6, [#allocation10]  }
  0x43   : > { %s3707_s10 = scalar_lea.hbm %s4304_s2, 96 }
  0x44   : > { %p3708_p11 = scmp.ne.s32.totalorder %s4304_s2, %s3707_s10  ;;  %p3714_p0 = scmp.lt.u32.totalorder %s3707_s10, %s4304_s2 }
  0x46   : > { %p3710_p12 = pnand %p3708_p11, %p3989_p8 }
  0x48   : > { %p3711_p13 = pneg %p3710_p12 }
  0x4a   : > { %p3716_p2 = pnand %p3714_p0, %p3711_p13 }
  0x4c   : > { %3719 = shalt.err (!%p3716_p2)
}
  0x4d   : > { %s3720_s16 = scalar_lea.vmem %s214_s8, 96  ;;  %p3728_p5 = scmp.lt.s32.totalorder %s214_s8, %s214_s8 }
  0x4e   : > { %p3721_p4 = scmp.ne.s32.totalorder %s214_s8, %s3720_s16  ;;  %p3729_p10 = scmp.lt.s32.totalorder %s3720_s16, %s3720_s16 }
  0x50   : > { %p3723_p7 = pnand %p3721_p4, %p3989_p8  ;;  %p3730_p3 = por %p3729_p10, %p3728_p5 }
  0x52   : > { %p3724_p9 = pneg %p3723_p7 }
  0x54   : > { %p3731_p1 = pnand %p3730_p3, %p3724_p9 }
  0x56   : > { %3734 = shalt.err (!%p3731_p1)
}
  0x57   : > { %3126 = dma.hbm_to_vmem [thread:$0]  (!%p3973_p6), %s4304_s2, 96, %s214_s8, [#allocation7]  }
  0x58   : > { %s3890_s28 = smov [#allocation11]   ;;  %s3735_s9 = scalar_lea.hbm %s4306_s4, 96 }
  0x59   : > { %s235_s27 = sshll.u32 %s3890_s28, 4  ;;  %p3736_p11 = scmp.ne.s32.totalorder %s4306_s4, %s3735_s9  ;;  %s236_s27 = int_to_ptr.vmem [resolvable:$true] %s235_s27 }
  0x5a   : > { %p3742_p12 = scmp.lt.u32.totalorder %s3735_s9, %s4306_s4 }
  0x5b   : > { %p3738_p1 = pnand %p3736_p11, %p3989_p8 }
  0x5d   : > { %p3739_p3 = pneg %p3738_p1 }
  0x5f   : > { %p3744_p13 = pnand %p3742_p12, %p3739_p3 }
  0x61   : > { %3747 = shalt.err (!%p3744_p13)
}
  0x62   : > { %s3748_s8 = scalar_lea.vmem %s236_s27, 96  ;;  %p3756_p7 = scmp.lt.s32.totalorder %s236_s27, %s236_s27 }
  0x63   : > { %p3749_p0 = scmp.ne.s32.totalorder %s236_s27, %s3748_s8  ;;  %p3757_p9 = scmp.lt.s32.totalorder %s3748_s8, %s3748_s8 }
  0x65   : > { %p3751_p2 = pnand %p3749_p0, %p3989_p8  ;;  %p3758_p5 = por %p3757_p9, %p3756_p7 }
  0x67   : > { %p3752_p4 = pneg %p3751_p2 }
  0x69   : > { %p3759_p10 = pnand %p3758_p5, %p3752_p4 }
  0x6b   : > { %3762 = shalt.err (!%p3759_p10)
}
  0x6c   : > { %3132 = dma.hbm_to_vmem [thread:$0]  (!%p3973_p6), %s4306_s4, 96, %s236_s27, [#allocation10]  }
  0x6d   : > { %s2792_s14 = sadd.s32 4294967294, %s3883_s23   ;;  %s35_s6 = sadd.s32 1, %s3879_s22 }
  0x6e   : > { %p37_p8 = scmp.ge.s32.totalorder %s35_s6, 2  ;;  %s44_s29 = sadd.s32 1, %s3871_s20 }
  0x6f   : > { %p51_p11 = scmp.ne.s32.totalorder %s3871_s20, %s3867_s19  ;;  %p52_p1 = scmp.eq.s32.totalorder %s3883_s23, 0 }
  0x70   : > { %s4335_s6 = smov (%p37_p8, %s35_s6), 0  ;;  %p57_p12 = scmp.ne.s32.totalorder %s3867_s19, %s3863_s18 }
  0x71   : > { %p4078_p3 = por %p52_p1, %p51_p11  ;;  %s39_s28 = ssub.s32 %s3879_s22, %s4335_s6 }
  0x72   : > { %p170_p6 = scmp.eq.s32.totalorder %s2791_s24, 1  ;;  %p42_p13 = scmp.eq.s32.totalorder %s39_s28, 0 }
  0x73   : > { %p4319_p0 = scmp.ne.s32.totalorder %s4313_s25, 0  ;;  %p176_p7 = scmp.eq.s32.totalorder %s2792_s14, 1 }
  0x74   : > { %p4094_p4 = por %p170_p6, %p51_p11  ;;  %p3145_p5 = scmp.lt.s32.totalorder %s3883_s23, 2 }
  0x75   : > { %p4090_p2 = por %p4319_p0, %p57_p12  ;;  %p4101_p9 = por %p176_p7, %p57_p12 }
  0x76   : > { %s4321_s30 = scalar_select %p4094_p4, 1, 0 }
  0x77   : > { %s4099_s7 = scalar_select %p42_p13, %s3871_s20, %s44_s29  }
  0x78   : > { %s4322_s9 = scalar_select %p4101_p9, 1, 0 }
  0x79   : > { %s246_s10 = sand.u32 1, %s3871_s20   ;;  %s3097_s24 = smul.u32 768, %s3879_s22 }
  0x7a   : > { %s3096_s11 = smul.u32 48, %s246_s10  ;;  %p4110_p10 = pnand %p3145_p5, %p4078_p3 }
  0x7b   : > { %s4117_s15 = scalar_lea.hbm %s4302_s0, %s3097_s24  ;;  %s247_s29 = scalar_lea.sflag [#allocation4], %s246_s10 }
  0x7c   : > { %s250_s16 = scalar_lea.vmem [#allocation3], %s3096_s11  ;;  %s3763_s17 = scalar_lea.hbm %s4117_s15, 768 }
  0x7d   : > { %s260_s14 = sshll.u32 %s250_s16, 4  ;;  %p3764_p8 = scmp.ne.s32.totalorder %s4117_s15, %s3763_s17  ;;  %s4119_s14 = int_to_ptr.vmem [resolvable:$true] %s260_s14 }
  0x7e   : > { %p3765_p11 = pneg %p4110_p10  ;;  %s3768_s13 = scalar_lea.hbm %s4302_s0, 1536 }
  0x7f   : > { %p3769_p12 = scmp.lt.u32.totalorder %s4117_s15, %s4302_s0  ;;  %p3770_p6 = scmp.lt.u32.totalorder %s3768_s13, %s3763_s17 }
  0x80   : > { %p3766_p1 = pnand %p3765_p11, %p3764_p8  ;;  %p3772_p0 = scmp.lt.u32.totalorder %s3763_s17, %s4117_s15 }
  0x81   : > { %p3771_p13 = por %p3770_p6, %p3769_p12 }
  0x82   : > { %p3767_p3 = pneg %p3766_p1 }
  0x83   : > { %p3773_p7 = por %p3772_p0, %p3771_p13 }
  0x85   : > { %p3774_p5 = pnand %p3773_p7, %p3767_p3 }
  0x87   : > { %3777 = shalt.err (!%p3774_p5)
}
  0x88   : > { %s3778_s10 = scalar_lea.vmem %s4119_s14, 768  ;;  %s3891_s11 = smov [#allocation3]  }
  0x89   : > { %p3779_p8 = scmp.ne.s32.totalorder %s4119_s14, %s3778_s10  ;;  %s3783_s16 = sshll.u32 %s3891_s11, 4  ;;  %s3784_s16 = int_to_ptr.vmem [resolvable:$false] %s3783_s16 }
  0x8a   : > { %s3785_s1 = scalar_lea.vmem %s3784_s16, 1536  ;;  %p3786_p4 = scmp.lt.s32.totalorder %s4119_s14, %s3784_s16 }
  0x8b   : > { %p3781_p1 = pnand %p3779_p8, %p3765_p11  ;;  %p3787_p12 = scmp.lt.s32.totalorder %s3785_s1, %s3778_s10 }
  0x8d   : > { %p3782_p9 = pneg %p3781_p1  ;;  %p3788_p6 = por %p3787_p12, %p3786_p4 }
  0x8f   : > { %p3789_p13 = pnand %p3788_p6, %p3782_p9 }
  0x91   : > { %3792 = shalt.err (!%p3789_p13)
}
  0x92   : > { %3136 = dma.hbm_to_vmem [thread:$0]  (!%p4110_p10), %s4117_s15, 768, %s4119_s14, %s247_s29  }
  0x93   : > { %p4324_p3 = scmp.ne.s32.totalorder %s4314_s26, 0 }
  0x94   : > { %s4149_s17 = sand.u32 (!%p4324_p3), 1, %s3867_s19  }
  0x95   : > { %269 = sbr.rel (%p4324_p3) target bundleno = 907 (0x38b), region = 40  ;;  %s272_s24 = scalar_lea.sflag (!%p4324_p3), [#allocation4], %s4149_s17 }
  0x96   : > { %s3098_s28 = smul.u32 (!%p4324_p3), 48, %s4149_s17 }
  0x98   : > { %s4155_s13 = scalar_lea.vmem (!%p4324_p3), [#allocation3], %s3098_s28 }
  0x9c   : > { %3846 = dma.done.wait (%p4090_p2), %s272_s24, 768  }
  0x9d   : > { %3848 = vsyncadd (%p4090_p2), %s272_s24, 4294966528  ;;  %p4325_p4 = scmp.ne.s32.totalorder %s4313_s25, 0 }
  0x9f   : > { %3850 = dma.done.wait (%p4325_p4), [#allocation7], 36960  }
  0xa0   : > { %3852 = vsyncadd (%p4325_p4), [#allocation7], 4294930336 }
  0xa1   : > { %3854 = dma.done.wait (%p4325_p4), [#allocation10], 192  }
  0xa2   : > { %3856 = vsyncadd (%p4325_p4), [#allocation10], 4294967104  ;;  %v3205_v0 = vld [vmem:[#allocation6 + $0x4] ss:$24 sps:$4 sm:$0xff]   ;;  %v3209_v2 = vld [vmem:[#allocation6] ss:$24 sps:$4 sm:$0xff]  }
  0xa3   : > { %v3207_v1 = vld [vmem:[#allocation6 + $0x304] ss:$24 sps:$4 sm:$0xff]   ;;  %2076 = vmatprep.subr.bf16.mxu0 %v3205_v0  ;;  %v3210_v3 = vld [vmem:[#allocation6 + $0x300] ss:$24 sps:$4 sm:$0xff]   ;;  %v3211_v4 = vld [vmem:[#allocation6 + $0x34] ss:$24 sps:$4 sm:$0xff]  }
  0xa4   : > { %2117 = vmatprep.subr.bf16.mxu1 %v3207_v1  ;;  %2077 = vmatpush1.bf16.msra.mxu0 %v3209_v2  ;;  %v3213_v5 = vld [vmem:[#allocation6 + $0x334] ss:$24 sps:$4 sm:$0xff]   ;;  %v3215_v6 = vld [vmem:[#allocation6 + $0x30] ss:$24 sps:$4 sm:$0xff]   ;;  %v3217_v8 = vld [vmem:[#allocation6 + $0x64] ss:$24 sps:$4 sm:$0xff]  }
  0xa5   : > { %2118 = vmatpush1.bf16.msra.mxu1 %v3210_v3  ;;  %2078 = vmatprep.subr.bf16.mxu0 %v3211_v4  ;;  %v3216_v7 = vld [vmem:[#allocation6 + $0x330] ss:$24 sps:$4 sm:$0xff]   ;;  %v3219_v9 = vld [vmem:[#allocation6 + $0x364] ss:$24 sps:$4 sm:$0xff]   ;;  %v3221_v10 = vld [vmem:[#allocation6 + $0x60] ss:$24 sps:$4 sm:$0xff]  }
  0xa6   : > { %2119 = vmatprep.subr.bf16.mxu1 %v3213_v5  ;;  %v3222_v11 = vld [vmem:[#allocation6 + $0x360] ss:$24 sps:$4 sm:$0xff]   ;;  %v3223_v12 = vld [vmem:[#allocation6 + $0x94] ss:$24 sps:$4 sm:$0xff]   ;;  %v3227_v14 = vld [vmem:[#allocation6 + $0x90] ss:$24 sps:$4 sm:$0xff]  }
  0xa7   : > { %v3225_v13 = vld [vmem:[#allocation6 + $0x394] ss:$24 sps:$4 sm:$0xff]   ;;  %v3228_v15 = vld [vmem:[#allocation6 + $0x390] ss:$24 sps:$4 sm:$0xff]   ;;  %v3229_v16 = vld [vmem:[#allocation6 + $0xc4] ss:$24 sps:$4 sm:$0xff]  }
  0xa8   : > { %2079 = vmatpush1.bf16.msra.mxu0 %v3215_v6  ;;  %v3231_v17 = vld [vmem:[#allocation6 + $0x3c4] ss:$24 sps:$4 sm:$0xff]   ;;  %v3233_v18 = vld [vmem:[#allocation6 + $0xc0] ss:$24 sps:$4 sm:$0xff]   ;;  %v3235_v20 = vld [vmem:[#allocation6 + $0xf4] ss:$24 sps:$4 sm:$0xff]  }
  0xa9   : > { %2120 = vmatpush1.bf16.msra.mxu1 %v3216_v7  ;;  %2080 = vmatprep.subr.bf16.mxu0 %v3217_v8  ;;  %v3234_v19 = vld [vmem:[#allocation6 + $0x3c0] ss:$24 sps:$4 sm:$0xff]   ;;  %v3237_v21 = vld [vmem:[#allocation6 + $0x3f4] ss:$24 sps:$4 sm:$0xff]   ;;  %v3239_v22 = vld [vmem:[#allocation6 + $0xf0] ss:$24 sps:$4 sm:$0xff]  }
  0xaa   : > { %2121 = vmatprep.subr.bf16.mxu1 %v3219_v9  ;;  %v3240_v23 = vld [vmem:[#allocation6 + $0x3f0] ss:$24 sps:$4 sm:$0xff]   ;;  %v3241_v24 = vld [vmem:[#allocation6 + $0x124] ss:$24 sps:$4 sm:$0xff]   ;;  %v3245_v26 = vld [vmem:[#allocation6 + $0x120] ss:$24 sps:$4 sm:$0xff]  }
  0xab   : > { %v3243_v25 = vld [vmem:[#allocation6 + $0x424] ss:$24 sps:$4 sm:$0xff]   ;;  %v3246_v27 = vld [vmem:[#allocation6 + $0x420] ss:$24 sps:$4 sm:$0xff]   ;;  %v3247_v28 = vld [vmem:[#allocation6 + $0x154] ss:$24 sps:$4 sm:$0xff]  }
  0xac   : > { %2081 = vmatpush1.bf16.msra.mxu0 %v3221_v10  ;;  %v3249_v29 = vld [vmem:[#allocation6 + $0x454] ss:$24 sps:$4 sm:$0xff]   ;;  %v3251_v30 = vld [vmem:[#allocation6 + $0x150] ss:$24 sps:$4 sm:$0xff]   ;;  %v3253_v32 = vld [vmem:[#allocation6 + $0x184] ss:$24 sps:$4 sm:$0xff]  }
  0xad   : > { %2122 = vmatpush1.bf16.msra.mxu1 %v3222_v11  ;;  %2082 = vmatprep.subr.bf16.mxu0 %v3223_v12  ;;  %v3252_v31 = vld [vmem:[#allocation6 + $0x450] ss:$24 sps:$4 sm:$0xff]   ;;  %v3255_v33 = vld [vmem:[#allocation6 + $0x484] ss:$24 sps:$4 sm:$0xff]   ;;  %v3257_v34 = vld [vmem:[#allocation6 + $0x180] ss:$24 sps:$4 sm:$0xff]  }
  0xae   : > { %2123 = vmatprep.subr.bf16.mxu1 %v3225_v13  ;;  %v3258_v35 = vld [vmem:[#allocation6 + $0x480] ss:$24 sps:$4 sm:$0xff]   ;;  %v3259_v36 = vld [vmem:[#allocation6 + $0x1b4] ss:$24 sps:$4 sm:$0xff]   ;;  %v3263_v38 = vld [vmem:[#allocation6 + $0x1b0] ss:$24 sps:$4 sm:$0xff]  }
  0xaf   : > { %v3261_v37 = vld [vmem:[#allocation6 + $0x4b4] ss:$24 sps:$4 sm:$0xff]   ;;  %v3264_v39 = vld [vmem:[#allocation6 + $0x4b0] ss:$24 sps:$4 sm:$0xff]   ;;  %v3265_v40 = vld [vmem:[#allocation6 + $0x1e4] ss:$24 sps:$4 sm:$0xff]  }
  0xb0   : > { %2083 = vmatpush1.bf16.msra.mxu0 %v3227_v14  ;;  %v3267_v41 = vld [vmem:[#allocation6 + $0x4e4] ss:$24 sps:$4 sm:$0xff]   ;;  %v3269_v42 = vld [vmem:[#allocation6 + $0x1e0] ss:$24 sps:$4 sm:$0xff]   ;;  %v3271_v44 = vld [vmem:[#allocation6 + $0x214] ss:$24 sps:$4 sm:$0xff]  }
  0xb1   : > { %2124 = vmatpush1.bf16.msra.mxu1 %v3228_v15  ;;  %2084 = vmatprep.subr.bf16.mxu0 %v3229_v16  ;;  %v3270_v43 = vld [vmem:[#allocation6 + $0x4e0] ss:$24 sps:$4 sm:$0xff]   ;;  %v3273_v45 = vld [vmem:[#allocation6 + $0x514] ss:$24 sps:$4 sm:$0xff]   ;;  %v3275_v47 = vld [vmem:[#allocation6 + $0x210] ss:$24 sps:$4 sm:$0xff]  }
  0xb2   : > { %2125 = vmatprep.subr.bf16.mxu1 %v3231_v17  ;;  %v331_v46 = vld [vmem:[%s4155_s13 + $0x8] sm:$0xff]  ;;  %v333_v50 = vld [vmem:[%s4155_s13 + $0x18] sm:$0xff]  ;;  %v330_v4 = vld [vmem:[%s4155_s13] sm:$0xff]  ;;  %s3099_s25 = smul.u32 768, %s3875_s21  ;;  %s317_s26 = scalar_lea.vmem [#allocation12], %s3098_s28 }
  0xb3   : > { %v3276_v48 = vld [vmem:[#allocation6 + $0x510] ss:$24 sps:$4 sm:$0xff]   ;;  %v4170_v49 = vpack.c.bf16 %v331_v46, %v331_v46  ;;  %v3277_v51 = vld [vmem:[#allocation6 + $0x244] ss:$24 sps:$4 sm:$0xff]   ;;  %v4173_v52 = vpack.c.bf16 %v333_v50, %v333_v50  ;;  %v3281_v54 = vld [vmem:[#allocation6 + $0x240] ss:$24 sps:$4 sm:$0xff]   ;;  %v4179_v8 = vpack.c.bf16 %v330_v4, %v330_v4 }
  0xb4   : > { %2085 = vmatpush1.bf16.msra.mxu0 %v3233_v18  ;;  %v3279_v53 = vld [vmem:[#allocation6 + $0x544] ss:$24 sps:$4 sm:$0xff]   ;;  %v3282_v55 = vld [vmem:[#allocation6 + $0x540] ss:$24 sps:$4 sm:$0xff]   ;;  %v3283_v56 = vld [vmem:[#allocation6 + $0x274] ss:$24 sps:$4 sm:$0xff]   ;;  %s4253_s21 = scalar_lea.hbm %s4307_s5, %s3099_s25 }
  0xb5   : > { %2126 = vmatpush1.bf16.msra.mxu1 %v3234_v19  ;;  %2086 = vmatprep.subr.bf16.mxu0 %v3235_v20  ;;  %v3285_v57 = vld [vmem:[#allocation6 + $0x574] ss:$24 sps:$4 sm:$0xff]   ;;  %v3287_v58 = vld [vmem:[#allocation6 + $0x270] ss:$24 sps:$4 sm:$0xff]   ;;  %v3289_v60 = vld [vmem:[#allocation6 + $0x2a4] ss:$24 sps:$4 sm:$0xff]  }
  0xb6   : > { %2127 = vmatprep.subr.bf16.mxu1 %v3237_v21  ;;  %2108 = vmatprep.mubr.bf16.mxu0 %v4170_v49  ;;  %v3288_v59 = vld [vmem:[#allocation6 + $0x570] ss:$24 sps:$4 sm:$0xff]   ;;  %v3291_v61 = vld [vmem:[#allocation6 + $0x5a4] ss:$24 sps:$4 sm:$0xff]   ;;  %v3293_v62 = vld [vmem:[#allocation6 + $0x2a0] ss:$24 sps:$4 sm:$0xff]  }
  0xb7   : > { %2149 = vmatprep.mubr.bf16.mxu1 %v4173_v52  ;;  %v3294_v63 = vld [vmem:[#allocation6 + $0x5a0] ss:$24 sps:$4 sm:$0xff]   ;;  %v3295_v0 = vld [vmem:[#allocation6 + $0x2d4] ss:$24 sps:$4 sm:$0xff]   ;;  %v3299_v2 = vld [vmem:[#allocation6 + $0x2d0] ss:$24 sps:$4 sm:$0xff]  }
  0xb8   : > { %2087 = vmatpush1.bf16.msra.mxu0 %v3239_v22  ;;  %v3297_v1 = vld [vmem:[#allocation6 + $0x5d4] ss:$24 sps:$4 sm:$0xff]   ;;  %v3300_v3 = vld [vmem:[#allocation6 + $0x5d0] ss:$24 sps:$4 sm:$0xff]   ;;  %v3303_v6 = vld [vmem:[#allocation6 + $0x604] ss:$24 sps:$4 sm:$0xff]  }
  0xb9   : > { %2128 = vmatpush1.bf16.msra.mxu1 %v3240_v23  ;;  %2088 = vmatprep.subr.bf16.mxu0 %v3241_v24  ;;  %v332_v5 = vld [vmem:[%s4155_s13 + $0x10] sm:$0xff]  ;;  %s2670_s27 = sshll.u32 %s317_s26, 4  ;;  %s2656_s14 = scalar_lea.sflag [#allocation5], %s4149_s17  ;;  %s4255_s27 = int_to_ptr.vmem [resolvable:$true] %s2670_s27 }
  0xba   : > { %2129 = vmatprep.subr.bf16.mxu1 %v3243_v25  ;;  %v3306_v7 = vld [vmem:[#allocation6 + $0xc] ss:$24 sps:$4 sm:$0xff]   ;;  %v4181_v9 = vpack.c.bf16 %v332_v5, %v332_v5  ;;  %v3301_v10 = vld [vmem:[#allocation6 + $0x600] ss:$24 sps:$4 sm:$0xff]   ;;  %v3312_v13 = vld [vmem:[#allocation6 + $0x3c] ss:$24 sps:$4 sm:$0xff]  }
  0xbb   : > { %v3304_v11 = vld [vmem:[#allocation6 + $0x8] ss:$24 sps:$4 sm:$0xff]   ;;  %v3309_v12 = vld [vmem:[#allocation6 + $0x634] ss:$24 sps:$4 sm:$0xff]   ;;  %v3310_v15 = vld [vmem:[#allocation6 + $0x38] ss:$24 sps:$4 sm:$0xff]  }
  0xbc   : > { %2089 = vmatpush1.bf16.msra.mxu0 %v3245_v26  ;;  %v3307_v14 = vld [vmem:[#allocation6 + $0x630] ss:$24 sps:$4 sm:$0xff]   ;;  %v3315_v16 = vld [vmem:[#allocation6 + $0x664] ss:$24 sps:$4 sm:$0xff]   ;;  %v3313_v18 = vld [vmem:[#allocation6 + $0x660] ss:$24 sps:$4 sm:$0xff]  }
  0xbd   : > { %2130 = vmatpush1.bf16.msra.mxu1 %v3246_v27  ;;  %2090 = vmatprep.subr.bf16.mxu0 %v3247_v28  ;;  %v3318_v17 = vld [vmem:[#allocation6 + $0x6c] ss:$24 sps:$4 sm:$0xff]   ;;  %v3316_v19 = vld [vmem:[#allocation6 + $0x68] ss:$24 sps:$4 sm:$0xff]   ;;  %v3324_v21 = vld [vmem:[#allocation6 + $0x9c] ss:$24 sps:$4 sm:$0xff]  }
  0xbe   : > { %2131 = vmatprep.subr.bf16.mxu1 %v3249_v29  ;;  %v3321_v20 = vld [vmem:[#allocation6 + $0x694] ss:$24 sps:$4 sm:$0xff]   ;;  %v3319_v22 = vld [vmem:[#allocation6 + $0x690] ss:$24 sps:$4 sm:$0xff]   ;;  %v3327_v24 = vld [vmem:[#allocation6 + $0x6c4] ss:$24 sps:$4 sm:$0xff]  }
  0xbf   : > { %v3322_v23 = vld [vmem:[#allocation6 + $0x98] ss:$24 sps:$4 sm:$0xff]   ;;  %v3330_v25 = vld [vmem:[#allocation6 + $0xcc] ss:$24 sps:$4 sm:$0xff]   ;;  %v3328_v27 = vld [vmem:[#allocation6 + $0xc8] ss:$24 sps:$4 sm:$0xff]  }
  0xc0   : > { %2091 = vmatpush1.bf16.msra.mxu0 %v3251_v30  ;;  %v3325_v26 = vld [vmem:[#allocation6 + $0x6c0] ss:$24 sps:$4 sm:$0xff]   ;;  %v3333_v28 = vld [vmem:[#allocation6 + $0x6f4] ss:$24 sps:$4 sm:$0xff]   ;;  %v3331_v30 = vld [vmem:[#allocation6 + $0x6f0] ss:$24 sps:$4 sm:$0xff]  }
  0xc1   : > { %2132 = vmatpush1.bf16.msra.mxu1 %v3252_v31  ;;  %2092 = vmatprep.subr.bf16.mxu0 %v3253_v32  ;;  %v3336_v29 = vld [vmem:[#allocation6 + $0xfc] ss:$24 sps:$4 sm:$0xff]   ;;  %v3334_v31 = vld [vmem:[#allocation6 + $0xf8] ss:$24 sps:$4 sm:$0xff]   ;;  %v3390_v5 = vld [vmem:[#allocation6 + $0x2ac] ss:$24 sps:$4 sm:$0xff]  }
  0xc2   : > { %2133 = vmatprep.subr.bf16.mxu1 %v3255_v33  ;;  %v3339_v32 = vld [vmem:[#allocation6 + $0x724] ss:$24 sps:$4 sm:$0xff]   ;;  %v3357_v46 = vld [vmem:[#allocation6 + $0x7b4] ss:$24 sps:$4 sm:$0xff]   ;;  %v3358_v50 = vld [vmem:[#allocation6 + $0x1b8] ss:$24 sps:$4 sm:$0xff]  }
  0xc3   : > { %v3342_v33 = vld [vmem:[#allocation6 + $0x12c] ss:$24 sps:$4 sm:$0xff]   ;;  %s3793_s29 = scalar_lea.vmem %s4255_s27, 768  ;;  %p4326_p9 = scmp.ne.s32.totalorder %s4321_s30, 0 }
  0xc4   : > { %2093 = vmatpush1.bf16.msra.mxu0 %v3257_v34  ;;  %v335_v34 = vld [vmem:[%s4155_s13 + $0x28] sm:$0xff]  ;;  %p3794_p2 = scmp.ne.s32.totalorder %s4255_s27, %s3793_s29  ;;  %s3892_s8 = smov [#allocation12]  }
  0xc5   : > { %2134 = vmatpush1.bf16.msra.mxu1 %v3258_v35  ;;  %2094 = vmatprep.subr.bf16.mxu0 %v3259_v36  ;;  %v4187_v35 = vpack.c.bf16 %v335_v34, %v335_v34  ;;  %v3337_v36 = vld [vmem:[#allocation6 + $0x720] ss:$24 sps:$4 sm:$0xff]   ;;  %v3387_v4 = vld [vmem:[#allocation6 + $0x8a4] ss:$24 sps:$4 sm:$0xff]   ;;  %s3797_s10 = sshll.u32 %s3892_s8, 4  ;;  %s3798_s10 = int_to_ptr.vmem [resolvable:$false] %s3797_s10 }
  0xc6   : > { %2135 = vmatprep.subr.bf16.mxu1 %v3261_v37  ;;  %v3340_v37 = vld [vmem:[#allocation6 + $0x128] ss:$24 sps:$4 sm:$0xff]   ;;  %p3795_p10 = pnand %p3794_p2, %p4326_p9  ;;  %s3799_s11 = scalar_lea.vmem %s3798_s10, 1536 }
  0xc7   : > { %v3421_v34 = vld [vmem:[#allocation6 + $0x3c8] ss:$24 sps:$4 sm:$0xff]   ;;  %p3800_p0 = scmp.lt.s32.totalorder %s4255_s27, %s3798_s10  ;;  %p3801_p7 = scmp.lt.s32.totalorder %s3799_s11, %s3793_s29 }
  0xc8   : > { %2095 = vmatpush1.bf16.msra.mxu0 %v3263_v38  ;;  %v3345_v38 = vld [vmem:[#allocation6 + $0x754] ss:$24 sps:$4 sm:$0xff]   ;;  %p3796_p11 = pneg %p3795_p10 }
  0xc9   : > { %2136 = vmatpush1.bf16.msra.mxu1 %v3264_v39  ;;  %2096 = vmatprep.subr.bf16.mxu0 %v3265_v40  ;;  %v3348_v39 = vld [vmem:[#allocation6 + $0x15c] ss:$24 sps:$4 sm:$0xff]   ;;  %v3343_v40 = vld [vmem:[#allocation6 + $0x750] ss:$24 sps:$4 sm:$0xff]   ;;  %p3802_p5 = por %p3801_p7, %p3800_p0 }
  0xca   : > { %2137 = vmatprep.subr.bf16.mxu1 %v3267_v41  ;;  %v3346_v41 = vld [vmem:[#allocation6 + $0x158] ss:$24 sps:$4 sm:$0xff]  }
  0xcb   : > { %p3803_p8 = pnand %p3802_p5, %p3796_p11 }
  0xcc   : > { %2097 = vmatpush1.bf16.msra.mxu0 %v3269_v42  ;;  %v3351_v42 = vld [vmem:[#allocation6 + $0x784] ss:$24 sps:$4 sm:$0xff]  }
  0xcd   : > { %2138 = vmatpush1.bf16.msra.mxu1 %v3270_v43  ;;  %2098 = vmatprep.subr.bf16.mxu0 %v3271_v44  ;;  %v3354_v43 = vld [vmem:[#allocation6 + $0x18c] ss:$24 sps:$4 sm:$0xff]   ;;  %v3349_v44 = vld [vmem:[#allocation6 + $0x780] ss:$24 sps:$4 sm:$0xff]  }
  0xce   : > { %2139 = vmatprep.subr.bf16.mxu1 %v3273_v45  ;;  %v3352_v45 = vld [vmem:[#allocation6 + $0x188] ss:$24 sps:$4 sm:$0xff]  }
  0xd0   : > { %2099 = vmatpush1.bf16.msra.mxu0 %v3275_v47  ;;  %v3360_v47 = vld [vmem:[#allocation6 + $0x1bc] ss:$24 sps:$4 sm:$0xff]  }
  0xd1   : > { %2140 = vmatpush1.bf16.msra.mxu1 %v3276_v48  ;;  %2100 = vmatprep.subr.bf16.mxu0 %v3277_v51  ;;  %v3355_v48 = vld [vmem:[#allocation6 + $0x7b0] ss:$24 sps:$4 sm:$0xff]   ;;  %v3363_v51 = vld [vmem:[#allocation6 + $0x7e4] ss:$24 sps:$4 sm:$0xff]  }
  0xd2   : > { %2141 = vmatprep.subr.bf16.mxu1 %v3279_v53  ;;  %v3366_v53 = vld [vmem:[#allocation6 + $0x1ec] ss:$24 sps:$4 sm:$0xff]  }
  0xd4   : > { %2101 = vmatpush1.bf16.msra.mxu0 %v3281_v54  ;;  %v3361_v54 = vld [vmem:[#allocation6 + $0x7e0] ss:$24 sps:$4 sm:$0xff]  }
  0xd5   : > { %2142 = vmatpush1.bf16.msra.mxu1 %v3282_v55  ;;  %2102 = vmatprep.subr.bf16.mxu0 %v3283_v56  ;;  %v3364_v55 = vld [vmem:[#allocation6 + $0x1e8] ss:$24 sps:$4 sm:$0xff]   ;;  %v3369_v56 = vld [vmem:[#allocation6 + $0x814] ss:$24 sps:$4 sm:$0xff]  }
  0xd6   : > { %2143 = vmatprep.subr.bf16.mxu1 %v3285_v57  ;;  %v3372_v57 = vld [vmem:[#allocation6 + $0x21c] ss:$24 sps:$4 sm:$0xff]  }
  0xd8   : > { %2103 = vmatpush1.bf16.msra.mxu0 %v3287_v58  ;;  %v3367_v58 = vld [vmem:[#allocation6 + $0x810] ss:$24 sps:$4 sm:$0xff]  }
  0xd9   : > { %2144 = vmatpush1.bf16.msra.mxu1 %v3288_v59  ;;  %2104 = vmatprep.subr.bf16.mxu0 %v3289_v60  ;;  %v3370_v59 = vld [vmem:[#allocation6 + $0x218] ss:$24 sps:$4 sm:$0xff]   ;;  %v3375_v60 = vld [vmem:[#allocation6 + $0x844] ss:$24 sps:$4 sm:$0xff]  }
  0xda   : > { %2145 = vmatprep.subr.bf16.mxu1 %v3291_v61  ;;  %v3378_v61 = vld [vmem:[#allocation6 + $0x24c] ss:$24 sps:$4 sm:$0xff]  }
  0xdc   : > { %2105 = vmatpush1.bf16.msra.mxu0 %v3293_v62  ;;  %v3373_v62 = vld [vmem:[#allocation6 + $0x840] ss:$24 sps:$4 sm:$0xff]  }
  0xdd   : > { %2146 = vmatpush1.bf16.msra.mxu1 %v3294_v63  ;;  %2106 = vmatprep.subr.bf16.mxu0 %v3295_v0  ;;  %v3376_v63 = vld [vmem:[#allocation6 + $0x248] ss:$24 sps:$4 sm:$0xff]   ;;  %v3381_v0 = vld [vmem:[#allocation6 + $0x874] ss:$24 sps:$4 sm:$0xff]  }
  0xde   : > { %2147 = vmatprep.subr.bf16.mxu1 %v3297_v1  ;;  %v3384_v1 = vld [vmem:[#allocation6 + $0x27c] ss:$24 sps:$4 sm:$0xff]  }
  0xe0   : > { %2107 = vmatpush1.bf16.msra.mxu0 %v3299_v2  ;;  %v3379_v2 = vld [vmem:[#allocation6 + $0x870] ss:$24 sps:$4 sm:$0xff]  }
  0xe1   : > { %2148 = vmatpush1.bf16.msra.mxu1 %v3300_v3  ;;  %2158 = vmatprep.subr.bf16.mxu0 %v3303_v6  ;;  %v3382_v3 = vld [vmem:[#allocation6 + $0x278] ss:$24 sps:$4 sm:$0xff]  }
  0xe2   : > { %2199 = vmatprep.subr.bf16.mxu1 %v3306_v7  ;;  %v3385_v6 = vld [vmem:[#allocation6 + $0x8a0] ss:$24 sps:$4 sm:$0xff]  }
  0xe3   : > { %2109 = vmatmul.mubr.bf16.vlgmr.msra.gmra.mrb[0].mxu0 %v4179_v8  ;;  %v3388_v7 = vld [vmem:[#allocation6 + $0x2a8] ss:$24 sps:$4 sm:$0xff]  }
  0xe4   : > { %2150 = vmatmul.mubr.bf16.vlgmr.msra.gmra.mrb[0].mxu1 %v4181_v9  ;;  %2159 = vmatpush1.bf16.msra.mxu0 %v3301_v10  ;;  %v3393_v10 = vld [vmem:[#allocation6 + $0x8d4] ss:$24 sps:$4 sm:$0xff]  }
  0xe5   : > { %2200 = vmatpush1.bf16.msra.mxu1 %v3304_v11  ;;  %2160 = vmatprep.subr.bf16.mxu0 %v3309_v12  ;;  %v3396_v11 = vld [vmem:[#allocation6 + $0x2dc] ss:$24 sps:$4 sm:$0xff]   ;;  %v3391_v12 = vld [vmem:[#allocation6 + $0x8d0] ss:$24 sps:$4 sm:$0xff]  }
  0xe6   : > { %2201 = vmatprep.subr.bf16.mxu1 %v3312_v13  ;;  %2231 = vmatprep.mubr.bf16.mxu1 %v4170_v49  ;;  %v3394_v13 = vld [vmem:[#allocation6 + $0x2d8] ss:$24 sps:$4 sm:$0xff]  }
  0xe7   : > { %2190 = vmatprep.mubr.bf16.mxu0 %v4187_v35 }
  0xe8   : > { %2161 = vmatpush1.bf16.msra.mxu0 %v3307_v14  ;;  %v334_v14 = vld [vmem:[%s4155_s13 + $0x20] sm:$0xff] }
  0xe9   : > { %2202 = vmatpush1.bf16.msra.mxu1 %v3310_v15  ;;  %2162 = vmatprep.subr.bf16.mxu0 %v3315_v16  ;;  %v3399_v15 = vld [vmem:[#allocation6 + $0x30c] ss:$24 sps:$4 sm:$0xff]  }
  0xea   : > { %2203 = vmatprep.subr.bf16.mxu1 %v3318_v17  ;;  %v3402_v16 = vld [vmem:[#allocation6 + $0x60c] ss:$24 sps:$4 sm:$0xff]   ;;  %v4191_v17 = vpack.c.bf16 %v334_v14, %v334_v14 }
  0xeb   : > { %v3486_v14 = vld [vmem:[#allocation6 + $0x8ac] ss:$24 sps:$4 sm:$0xff]  }
  0xec   : > { %2163 = vmatpush1.bf16.msra.mxu0 %v3313_v18  ;;  %v3397_v18 = vld [vmem:[#allocation6 + $0x308] ss:$24 sps:$4 sm:$0xff]  }
  0xed   : > { %2204 = vmatpush1.bf16.msra.mxu1 %v3316_v19  ;;  %2164 = vmatprep.subr.bf16.mxu0 %v3321_v20  ;;  %v3400_v19 = vld [vmem:[#allocation6 + $0x608] ss:$24 sps:$4 sm:$0xff]   ;;  %v3405_v20 = vld [vmem:[#allocation6 + $0x33c] ss:$24 sps:$4 sm:$0xff]  }
  0xee   : > { %2205 = vmatprep.subr.bf16.mxu1 %v3324_v21  ;;  %v3408_v21 = vld [vmem:[#allocation6 + $0x63c] ss:$24 sps:$4 sm:$0xff]  }
  0xf0   : > { %2165 = vmatpush1.bf16.msra.mxu0 %v3319_v22  ;;  %v3403_v22 = vld [vmem:[#allocation6 + $0x338] ss:$24 sps:$4 sm:$0xff]  }
  0xf1   : > { %2206 = vmatpush1.bf16.msra.mxu1 %v3322_v23  ;;  %2166 = vmatprep.subr.bf16.mxu0 %v3327_v24  ;;  %v3406_v23 = vld [vmem:[#allocation6 + $0x638] ss:$24 sps:$4 sm:$0xff]   ;;  %v3411_v24 = vld [vmem:[#allocation6 + $0x36c] ss:$24 sps:$4 sm:$0xff]  }
  0xf2   : > { %2207 = vmatprep.subr.bf16.mxu1 %v3330_v25  ;;  %v3414_v25 = vld [vmem:[#allocation6 + $0x66c] ss:$24 sps:$4 sm:$0xff]  }
  0xf4   : > { %2167 = vmatpush1.bf16.msra.mxu0 %v3325_v26  ;;  %v3409_v26 = vld [vmem:[#allocation6 + $0x368] ss:$24 sps:$4 sm:$0xff]  }
  0xf5   : > { %2208 = vmatpush1.bf16.msra.mxu1 %v3328_v27  ;;  %2168 = vmatprep.subr.bf16.mxu0 %v3333_v28  ;;  %v3412_v27 = vld [vmem:[#allocation6 + $0x668] ss:$24 sps:$4 sm:$0xff]   ;;  %v3417_v28 = vld [vmem:[#allocation6 + $0x39c] ss:$24 sps:$4 sm:$0xff]  }
  0xf6   : > { %2209 = vmatprep.subr.bf16.mxu1 %v3336_v29  ;;  %v3420_v29 = vld [vmem:[#allocation6 + $0x69c] ss:$24 sps:$4 sm:$0xff]  }
  0xf8   : > { %2169 = vmatpush1.bf16.msra.mxu0 %v3331_v30  ;;  %v3415_v30 = vld [vmem:[#allocation6 + $0x398] ss:$24 sps:$4 sm:$0xff]  }
  0xf9   : > { %2210 = vmatpush1.bf16.msra.mxu1 %v3334_v31  ;;  %2170 = vmatprep.subr.bf16.mxu0 %v3339_v32  ;;  %v3418_v31 = vld [vmem:[#allocation6 + $0x698] ss:$24 sps:$4 sm:$0xff]   ;;  %v3423_v32 = vld [vmem:[#allocation6 + $0x3cc] ss:$24 sps:$4 sm:$0xff]  }
  0xfa   : > { %2211 = vmatprep.subr.bf16.mxu1 %v3342_v33  ;;  %v3426_v33 = vld [vmem:[#allocation6 + $0x6cc] ss:$24 sps:$4 sm:$0xff]  }
  0xfc   : > { %2171 = vmatpush1.bf16.msra.mxu0 %v3337_v36  ;;  %v3424_v36 = vld [vmem:[#allocation6 + $0x6c8] ss:$24 sps:$4 sm:$0xff]  }
  0xfd   : > { %2212 = vmatpush1.bf16.msra.mxu1 %v3340_v37  ;;  %2172 = vmatprep.subr.bf16.mxu0 %v3345_v38  ;;  %v3429_v37 = vld [vmem:[#allocation6 + $0x3fc] ss:$24 sps:$4 sm:$0xff]  }
  0xfe   : > { %2213 = vmatprep.subr.bf16.mxu1 %v3348_v39  ;;  %v3432_v38 = vld [vmem:[#allocation6 + $0x6fc] ss:$24 sps:$4 sm:$0xff]   ;;  %v3427_v39 = vld [vmem:[#allocation6 + $0x3f8] ss:$24 sps:$4 sm:$0xff]  }
 0x100   : > { %2173 = vmatpush1.bf16.msra.mxu0 %v3343_v40  ;;  %v3430_v40 = vld [vmem:[#allocation6 + $0x6f8] ss:$24 sps:$4 sm:$0xff]  }
 0x101   : > { %2214 = vmatpush1.bf16.msra.mxu1 %v3346_v41  ;;  %2174 = vmatprep.subr.bf16.mxu0 %v3351_v42  ;;  %v3435_v41 = vld [vmem:[#allocation6 + $0x42c] ss:$24 sps:$4 sm:$0xff]  }
 0x102   : > { %2215 = vmatprep.subr.bf16.mxu1 %v3354_v43  ;;  %v3438_v42 = vld [vmem:[#allocation6 + $0x72c] ss:$24 sps:$4 sm:$0xff]   ;;  %v3433_v43 = vld [vmem:[#allocation6 + $0x428] ss:$24 sps:$4 sm:$0xff]  }
 0x104   : > { %2175 = vmatpush1.bf16.msra.mxu0 %v3349_v44  ;;  %v3436_v44 = vld [vmem:[#allocation6 + $0x728] ss:$24 sps:$4 sm:$0xff]  }
 0x105   : > { %2216 = vmatpush1.bf16.msra.mxu1 %v3352_v45  ;;  %2176 = vmatprep.subr.bf16.mxu0 %v3357_v46  ;;  %v3441_v45 = vld [vmem:[#allocation6 + $0x45c] ss:$24 sps:$4 sm:$0xff]  }
 0x106   : > { %2217 = vmatprep.subr.bf16.mxu1 %v3360_v47  ;;  %v3444_v46 = vld [vmem:[#allocation6 + $0x75c] ss:$24 sps:$4 sm:$0xff]   ;;  %v3439_v47 = vld [vmem:[#allocation6 + $0x458] ss:$24 sps:$4 sm:$0xff]  }
 0x108   : > { %2177 = vmatpush1.bf16.msra.mxu0 %v3355_v48  ;;  %v3442_v48 = vld [vmem:[#allocation6 + $0x758] ss:$24 sps:$4 sm:$0xff]  }
 0x109   : > { %2218 = vmatpush1.bf16.msra.mxu1 %v3358_v50  ;;  %2178 = vmatprep.subr.bf16.mxu0 %v3363_v51  ;;  %v3447_v50 = vld [vmem:[#allocation6 + $0x48c] ss:$24 sps:$4 sm:$0xff]  }
 0x10a   : > { %2219 = vmatprep.subr.bf16.mxu1 %v3366_v53  ;;  %v3450_v51 = vld [vmem:[#allocation6 + $0x78c] ss:$24 sps:$4 sm:$0xff]   ;;  %v3445_v53 = vld [vmem:[#allocation6 + $0x488] ss:$24 sps:$4 sm:$0xff]  }
 0x10c   : > { %2179 = vmatpush1.bf16.msra.mxu0 %v3361_v54  ;;  %v3448_v54 = vld [vmem:[#allocation6 + $0x788] ss:$24 sps:$4 sm:$0xff]  }
 0x10d   : > { %2220 = vmatpush1.bf16.msra.mxu1 %v3364_v55  ;;  %2180 = vmatprep.subr.bf16.mxu0 %v3369_v56  ;;  %v3453_v55 = vld [vmem:[#allocation6 + $0x4bc] ss:$24 sps:$4 sm:$0xff]  }
 0x10e   : > { %2221 = vmatprep.subr.bf16.mxu1 %v3372_v57  ;;  %v3456_v56 = vld [vmem:[#allocation6 + $0x7bc] ss:$24 sps:$4 sm:$0xff]   ;;  %v3451_v57 = vld [vmem:[#allocation6 + $0x4b8] ss:$24 sps:$4 sm:$0xff]  }
 0x110   : > { %2181 = vmatpush1.bf16.msra.mxu0 %v3367_v58  ;;  %v3454_v58 = vld [vmem:[#allocation6 + $0x7b8] ss:$24 sps:$4 sm:$0xff]  }
 0x111   : > { %2222 = vmatpush1.bf16.msra.mxu1 %v3370_v59  ;;  %2182 = vmatprep.subr.bf16.mxu0 %v3375_v60  ;;  %v3459_v59 = vld [vmem:[#allocation6 + $0x4ec] ss:$24 sps:$4 sm:$0xff]  }
 0x112   : > { %2223 = vmatprep.subr.bf16.mxu1 %v3378_v61  ;;  %v3462_v60 = vld [vmem:[#allocation6 + $0x7ec] ss:$24 sps:$4 sm:$0xff]   ;;  %v3457_v61 = vld [vmem:[#allocation6 + $0x4e8] ss:$24 sps:$4 sm:$0xff]  }
 0x114   : > { %2183 = vmatpush1.bf16.msra.mxu0 %v3373_v62  ;;  %v3460_v62 = vld [vmem:[#allocation6 + $0x7e8] ss:$24 sps:$4 sm:$0xff]  }
 0x115   : > { %2224 = vmatpush1.bf16.msra.mxu1 %v3376_v63  ;;  %2184 = vmatprep.subr.bf16.mxu0 %v3381_v0  ;;  %v3465_v63 = vld [vmem:[#allocation6 + $0x51c] ss:$24 sps:$4 sm:$0xff]  }
 0x116   : > { %2225 = vmatprep.subr.bf16.mxu1 %v3384_v1  ;;  %v3468_v0 = vld [vmem:[#allocation6 + $0x81c] ss:$24 sps:$4 sm:$0xff]   ;;  %v3463_v1 = vld [vmem:[#allocation6 + $0x518] ss:$24 sps:$4 sm:$0xff]  }
 0x118   : > { %2185 = vmatpush1.bf16.msra.mxu0 %v3379_v2  ;;  %v3466_v2 = vld [vmem:[#allocation6 + $0x818] ss:$24 sps:$4 sm:$0xff]  }
 0x119   : > { %2226 = vmatpush1.bf16.msra.mxu1 %v3382_v3  ;;  %2186 = vmatprep.subr.bf16.mxu0 %v3387_v4  ;;  %v3471_v3 = vld [vmem:[#allocation6 + $0x54c] ss:$24 sps:$4 sm:$0xff]  }
 0x11a   : > { %2227 = vmatprep.subr.bf16.mxu1 %v3390_v5  ;;  %v3474_v4 = vld [vmem:[#allocation6 + $0x84c] ss:$24 sps:$4 sm:$0xff]   ;;  %v3469_v5 = vld [vmem:[#allocation6 + $0x548] ss:$24 sps:$4 sm:$0xff]  }
 0x11c   : > { %2187 = vmatpush1.bf16.msra.mxu0 %v3385_v6  ;;  %v3472_v6 = vld [vmem:[#allocation6 + $0x848] ss:$24 sps:$4 sm:$0xff]  }
 0x11d   : > { %2228 = vmatpush1.bf16.msra.mxu1 %v3388_v7  ;;  %2188 = vmatprep.subr.bf16.mxu0 %v3393_v10  ;;  %v3477_v7 = vld [vmem:[#allocation6 + $0x57c] ss:$24 sps:$4 sm:$0xff]  }
 0x11e   : > { %2229 = vmatprep.subr.bf16.mxu1 %v3396_v11  ;;  %v3480_v10 = vld [vmem:[#allocation6 + $0x87c] ss:$24 sps:$4 sm:$0xff]   ;;  %v3475_v11 = vld [vmem:[#allocation6 + $0x578] ss:$24 sps:$4 sm:$0xff]  }
 0x120   : > { %2189 = vmatpush1.bf16.msra.mxu0 %v3391_v12  ;;  %v3478_v12 = vld [vmem:[#allocation6 + $0x878] ss:$24 sps:$4 sm:$0xff]  }
 0x121   : > { %2230 = vmatpush1.bf16.msra.mxu1 %v3394_v13  ;;  %2240 = vmatprep.subr.bf16.mxu0 %v3399_v15  ;;  %v3483_v13 = vld [vmem:[#allocation6 + $0x5ac] ss:$24 sps:$4 sm:$0xff]   ;;  %v3481_v15 = vld [vmem:[#allocation6 + $0x5a8] ss:$24 sps:$4 sm:$0xff]  }
 0x122   : > { %2281 = vmatprep.subr.bf16.mxu1 %v3402_v16  ;;  %v3484_v16 = vld [vmem:[#allocation6 + $0x8a8] ss:$24 sps:$4 sm:$0xff]  }
 0x123   : > { %2191 = vmatmul.mubr.bf16.vlgmr.msra.gmra.mrb[4].mxu0 %v4191_v17 }
 0x124   : > { %2232 = vmatmul.mubr.bf16.vlgmr.msra.gmra.mrb[4].mxu1 %v4179_v8  ;;  %2241 = vmatpush1.bf16.msra.mxu0 %v3397_v18  ;;  %v3489_v18 = vld [vmem:[#allocation6 + $0x5dc] ss:$24 sps:$4 sm:$0xff]  }
 0x125   : > { %2282 = vmatpush1.bf16.msra.mxu1 %v3400_v19  ;;  %2242 = vmatprep.subr.bf16.mxu0 %v3405_v20  ;;  %v3492_v19 = vld [vmem:[#allocation6 + $0x8dc] ss:$24 sps:$4 sm:$0xff]   ;;  %v3487_v20 = vld [vmem:[#allocation6 + $0x5d8] ss:$24 sps:$4 sm:$0xff]  }
 0x126   : > { %2283 = vmatprep.subr.bf16.mxu1 %v3408_v21  ;;  %2272 = vmatprep.mubr.bf16.mxu0 %v4173_v52  ;;  %v3490_v21 = vld [vmem:[#allocation6 + $0x8d8] ss:$24 sps:$4 sm:$0xff]  }
 0x127   : > { %2313 = vmatprep.mubr.bf16.mxu1 %v4187_v35 }
 0x128   : > { %2243 = vmatpush1.bf16.msra.mxu0 %v3403_v22  ;;  %v3495_v22 = vld [vmem:[#allocation6 + $0x14] ss:$24 sps:$4 sm:$0xff]  }
 0x129   : > { %2284 = vmatpush1.bf16.msra.mxu1 %v3406_v23  ;;  %2244 = vmatprep.subr.bf16.mxu0 %v3411_v24  ;;  %v3498_v23 = vld [vmem:[#allocation6 + $0x314] ss:$24 sps:$4 sm:$0xff]   ;;  %v3493_v24 = vld [vmem:[#allocation6 + $0x10] ss:$24 sps:$4 sm:$0xff]  }
 0x12a   : > { %2285 = vmatprep.subr.bf16.mxu1 %v3414_v25  ;;  %v3496_v25 = vld [vmem:[#allocation6 + $0x310] ss:$24 sps:$4 sm:$0xff]  }
 0x12c   : > { %2245 = vmatpush1.bf16.msra.mxu0 %v3409_v26  ;;  %v3501_v26 = vld [vmem:[#allocation6 + $0x44] ss:$24 sps:$4 sm:$0xff]  }
 0x12d   : > { %2286 = vmatpush1.bf16.msra.mxu1 %v3412_v27  ;;  %2246 = vmatprep.subr.bf16.mxu0 %v3417_v28  ;;  %v3504_v27 = vld [vmem:[#allocation6 + $0x344] ss:$24 sps:$4 sm:$0xff]   ;;  %v3499_v28 = vld [vmem:[#allocation6 + $0x40] ss:$24 sps:$4 sm:$0xff]  }
 0x12e   : > { %2287 = vmatprep.subr.bf16.mxu1 %v3420_v29  ;;  %v3502_v29 = vld [vmem:[#allocation6 + $0x340] ss:$24 sps:$4 sm:$0xff]  }
 0x130   : > { %2247 = vmatpush1.bf16.msra.mxu0 %v3415_v30  ;;  %v3507_v30 = vld [vmem:[#allocation6 + $0x74] ss:$24 sps:$4 sm:$0xff]  }
 0x131   : > { %2288 = vmatpush1.bf16.msra.mxu1 %v3418_v31  ;;  %2248 = vmatprep.subr.bf16.mxu0 %v3423_v32  ;;  %v3510_v31 = vld [vmem:[#allocation6 + $0x374] ss:$24 sps:$4 sm:$0xff]   ;;  %v3505_v32 = vld [vmem:[#allocation6 + $0x70] ss:$24 sps:$4 sm:$0xff]  }
 0x132   : > { %2289 = vmatprep.subr.bf16.mxu1 %v3426_v33  ;;  %v3508_v33 = vld [vmem:[#allocation6 + $0x370] ss:$24 sps:$4 sm:$0xff]  }
 0x134   : > { %2249 = vmatpush1.bf16.msra.mxu0 %v3421_v34  ;;  %v3513_v34 = vld [vmem:[#allocation6 + $0xa4] ss:$24 sps:$4 sm:$0xff]  }
 0x135   : > { %2290 = vmatpush1.bf16.msra.mxu1 %v3424_v36  ;;  %2250 = vmatprep.subr.bf16.mxu0 %v3429_v37  ;;  %v3516_v36 = vld [vmem:[#allocation6 + $0x3a4] ss:$24 sps:$4 sm:$0xff]   ;;  %v3511_v37 = vld [vmem:[#allocation6 + $0xa0] ss:$24 sps:$4 sm:$0xff]  }
 0x136   : > { %2291 = vmatprep.subr.bf16.mxu1 %v3432_v38  ;;  %v3514_v38 = vld [vmem:[#allocation6 + $0x3a0] ss:$24 sps:$4 sm:$0xff]  }
 0x138   : > { %2251 = vmatpush1.bf16.msra.mxu0 %v3427_v39  ;;  %v3519_v39 = vld [vmem:[#allocation6 + $0xd4] ss:$24 sps:$4 sm:$0xff]  }
 0x139   : > { %2292 = vmatpush1.bf16.msra.mxu1 %v3430_v40  ;;  %2252 = vmatprep.subr.bf16.mxu0 %v3435_v41  ;;  %v3522_v40 = vld [vmem:[#allocation6 + $0x3d4] ss:$24 sps:$4 sm:$0xff]   ;;  %v3525_v41 = vld [vmem:[#allocation6 + $0x104] ss:$24 sps:$4 sm:$0xff]  }
 0x13a   : > { %2293 = vmatprep.subr.bf16.mxu1 %v3438_v42  ;;  %v3528_v42 = vld [vmem:[#allocation6 + $0x404] ss:$24 sps:$4 sm:$0xff]  }
 0x13c   : > { %2253 = vmatpush1.bf16.msra.mxu0 %v3433_v43  ;;  %v3523_v43 = vld [vmem:[#allocation6 + $0x100] ss:$24 sps:$4 sm:$0xff]  }
 0x13d   : > { %2294 = vmatpush1.bf16.msra.mxu1 %v3436_v44  ;;  %2254 = vmatprep.subr.bf16.mxu0 %v3441_v45  ;;  %v3526_v44 = vld [vmem:[#allocation6 + $0x400] ss:$24 sps:$4 sm:$0xff]   ;;  %v3531_v45 = vld [vmem:[#allocation6 + $0x134] ss:$24 sps:$4 sm:$0xff]  }
 0x13e   : > { %2295 = vmatprep.subr.bf16.mxu1 %v3444_v46  ;;  %v3534_v46 = vld [vmem:[#allocation6 + $0x434] ss:$24 sps:$4 sm:$0xff]  }
 0x140   : > { %2255 = vmatpush1.bf16.msra.mxu0 %v3439_v47  ;;  %v3529_v47 = vld [vmem:[#allocation6 + $0x130] ss:$24 sps:$4 sm:$0xff]  }
 0x141   : > { %2296 = vmatpush1.bf16.msra.mxu1 %v3442_v48  ;;  %2256 = vmatprep.subr.bf16.mxu0 %v3447_v50  ;;  %v3532_v48 = vld [vmem:[#allocation6 + $0x430] ss:$24 sps:$4 sm:$0xff]   ;;  %v3537_v50 = vld [vmem:[#allocation6 + $0x164] ss:$24 sps:$4 sm:$0xff]  }
 0x142   : > { %2297 = vmatprep.subr.bf16.mxu1 %v3450_v51  ;;  %v3540_v51 = vld [vmem:[#allocation6 + $0x464] ss:$24 sps:$4 sm:$0xff]  }
 0x144   : > { %2257 = vmatpush1.bf16.msra.mxu0 %v3445_v53  ;;  %v3535_v53 = vld [vmem:[#allocation6 + $0x160] ss:$24 sps:$4 sm:$0xff]  }
 0x145   : > { %2298 = vmatpush1.bf16.msra.mxu1 %v3448_v54  ;;  %2258 = vmatprep.subr.bf16.mxu0 %v3453_v55  ;;  %v3538_v54 = vld [vmem:[#allocation6 + $0x460] ss:$24 sps:$4 sm:$0xff]   ;;  %v3543_v55 = vld [vmem:[#allocation6 + $0x194] ss:$24 sps:$4 sm:$0xff]  }
 0x146   : > { %2299 = vmatprep.subr.bf16.mxu1 %v3456_v56  ;;  %v3546_v56 = vld [vmem:[#allocation6 + $0x494] ss:$24 sps:$4 sm:$0xff]  }
 0x148   : > { %2259 = vmatpush1.bf16.msra.mxu0 %v3451_v57  ;;  %v3541_v57 = vld [vmem:[#allocation6 + $0x190] ss:$24 sps:$4 sm:$0xff]  }
 0x149   : > { %2300 = vmatpush1.bf16.msra.mxu1 %v3454_v58  ;;  %2260 = vmatprep.subr.bf16.mxu0 %v3459_v59  ;;  %v3544_v58 = vld [vmem:[#allocation6 + $0x490] ss:$24 sps:$4 sm:$0xff]   ;;  %v3549_v59 = vld [vmem:[#allocation6 + $0x1c4] ss:$24 sps:$4 sm:$0xff]  }
 0x14a   : > { %2301 = vmatprep.subr.bf16.mxu1 %v3462_v60  ;;  %v3552_v60 = vld [vmem:[#allocation6 + $0x4c4] ss:$24 sps:$4 sm:$0xff]  }
 0x14c   : > { %2261 = vmatpush1.bf16.msra.mxu0 %v3457_v61  ;;  %v3547_v61 = vld [vmem:[#allocation6 + $0x1c0] ss:$24 sps:$4 sm:$0xff]  }
 0x14d   : > { %2302 = vmatpush1.bf16.msra.mxu1 %v3460_v62  ;;  %2262 = vmatprep.subr.bf16.mxu0 %v3465_v63  ;;  %v3550_v62 = vld [vmem:[#allocation6 + $0x4c0] ss:$24 sps:$4 sm:$0xff]   ;;  %v3555_v63 = vld [vmem:[#allocation6 + $0x1f4] ss:$24 sps:$4 sm:$0xff]  }
 0x14e   : > { %2303 = vmatprep.subr.bf16.mxu1 %v3468_v0  ;;  %v3558_v0 = vld [vmem:[#allocation6 + $0x4f4] ss:$24 sps:$4 sm:$0xff]  }
 0x150   : > { %2263 = vmatpush1.bf16.msra.mxu0 %v3463_v1  ;;  %v3553_v1 = vld [vmem:[#allocation6 + $0x1f0] ss:$24 sps:$4 sm:$0xff]  }
 0x151   : > { %2304 = vmatpush1.bf16.msra.mxu1 %v3466_v2  ;;  %2264 = vmatprep.subr.bf16.mxu0 %v3471_v3  ;;  %v3556_v2 = vld [vmem:[#allocation6 + $0x4f0] ss:$24 sps:$4 sm:$0xff]   ;;  %v3561_v3 = vld [vmem:[#allocation6 + $0x224] ss:$24 sps:$4 sm:$0xff]  }
 0x152   : > { %2305 = vmatprep.subr.bf16.mxu1 %v3474_v4  ;;  %v3564_v4 = vld [vmem:[#allocation6 + $0x524] ss:$24 sps:$4 sm:$0xff]  }
 0x154   : > { %2265 = vmatpush1.bf16.msra.mxu0 %v3469_v5  ;;  %v3559_v5 = vld [vmem:[#allocation6 + $0x220] ss:$24 sps:$4 sm:$0xff]  }
 0x155   : > { %2306 = vmatpush1.bf16.msra.mxu1 %v3472_v6  ;;  %2266 = vmatprep.subr.bf16.mxu0 %v3477_v7  ;;  %v3562_v6 = vld [vmem:[#allocation6 + $0x520] ss:$24 sps:$4 sm:$0xff]   ;;  %v3567_v7 = vld [vmem:[#allocation6 + $0x254] ss:$24 sps:$4 sm:$0xff]  }
 0x156   : > { %2307 = vmatprep.subr.bf16.mxu1 %v3480_v10  ;;  %v3570_v10 = vld [vmem:[#allocation6 + $0x554] ss:$24 sps:$4 sm:$0xff]  }
 0x158   : > { %2267 = vmatpush1.bf16.msra.mxu0 %v3475_v11  ;;  %v3565_v11 = vld [vmem:[#allocation6 + $0x250] ss:$24 sps:$4 sm:$0xff]  }
 0x159   : > { %2308 = vmatpush1.bf16.msra.mxu1 %v3478_v12  ;;  %2268 = vmatprep.subr.bf16.mxu0 %v3483_v13  ;;  %v3568_v12 = vld [vmem:[#allocation6 + $0x550] ss:$24 sps:$4 sm:$0xff]   ;;  %v3573_v13 = vld [vmem:[#allocation6 + $0x284] ss:$24 sps:$4 sm:$0xff]  }
 0x15a   : > { %2309 = vmatprep.subr.bf16.mxu1 %v3486_v14  ;;  %v3576_v14 = vld [vmem:[#allocation6 + $0x584] ss:$24 sps:$4 sm:$0xff]  }
 0x15c   : > { %2269 = vmatpush1.bf16.msra.mxu0 %v3481_v15  ;;  %v3571_v15 = vld [vmem:[#allocation6 + $0x280] ss:$24 sps:$4 sm:$0xff]  }
 0x15d   : > { %2310 = vmatpush1.bf16.msra.mxu1 %v3484_v16  ;;  %2270 = vmatprep.subr.bf16.mxu0 %v3489_v18  ;;  %v3574_v16 = vld [vmem:[#allocation6 + $0x580] ss:$24 sps:$4 sm:$0xff]   ;;  %v3579_v18 = vld [vmem:[#allocation6 + $0x2b4] ss:$24 sps:$4 sm:$0xff]  }
 0x15e   : > { %2311 = vmatprep.subr.bf16.mxu1 %v3492_v19  ;;  %v3582_v19 = vld [vmem:[#allocation6 + $0x5b4] ss:$24 sps:$4 sm:$0xff]  }
 0x160   : > { %2271 = vmatpush1.bf16.msra.mxu0 %v3487_v20  ;;  %v3577_v20 = vld [vmem:[#allocation6 + $0x2b0] ss:$24 sps:$4 sm:$0xff]  }
 0x161   : > { %2312 = vmatpush1.bf16.msra.mxu1 %v3490_v21  ;;  %2322 = vmatprep.subr.bf16.mxu0 %v3495_v22  ;;  %v3580_v21 = vld [vmem:[#allocation6 + $0x5b0] ss:$24 sps:$4 sm:$0xff]   ;;  %v3585_v22 = vld [vmem:[#allocation6 + $0x2e4] ss:$24 sps:$4 sm:$0xff]  }
 0x162   : > { %2363 = vmatprep.subr.bf16.mxu1 %v3498_v23  ;;  %v3588_v23 = vld [vmem:[#allocation6 + $0x5e4] ss:$24 sps:$4 sm:$0xff]  }
 0x163   : > { %2273 = vmatmul.mubr.bf16.vlgmr.msra.gmra.mrb[8].mxu0 %v4181_v9 }
 0x164   : > { %2314 = vmatmul.mubr.bf16.vlgmr.msra.gmra.mrb[8].mxu1 %v4191_v17  ;;  %2323 = vmatpush1.bf16.msra.mxu0 %v3493_v24  ;;  %v3583_v24 = vld [vmem:[#allocation6 + $0x2e0] ss:$24 sps:$4 sm:$0xff]  }
 0x165   : > { %2364 = vmatpush1.bf16.msra.mxu1 %v3496_v25  ;;  %2324 = vmatprep.subr.bf16.mxu0 %v3501_v26  ;;  %v3586_v25 = vld [vmem:[#allocation6 + $0x5e0] ss:$24 sps:$4 sm:$0xff]   ;;  %v3591_v26 = vld [vmem:[#allocation6 + $0x614] ss:$24 sps:$4 sm:$0xff]  }
 0x166   : > { %2365 = vmatprep.subr.bf16.mxu1 %v3504_v27  ;;  %2354 = vmatprep.mubr.bf16.mxu0 %v4170_v49  ;;  %v3517_v49 = vld [vmem:[#allocation6 + $0xd0] ss:$24 sps:$4 sm:$0xff]  }
 0x167   : > { %2395 = vmatprep.mubr.bf16.mxu1 %v4173_v52  ;;  %v3520_v52 = vld [vmem:[#allocation6 + $0x3d0] ss:$24 sps:$4 sm:$0xff]  }
 0x168   : > { %2325 = vmatpush1.bf16.msra.mxu0 %v3499_v28  ;;  %v3589_v27 = vld [vmem:[#allocation6 + $0x610] ss:$24 sps:$4 sm:$0xff]   ;;  %v3594_v28 = vld [vmem:[#allocation6 + $0x644] ss:$24 sps:$4 sm:$0xff]  }
 0x169   : > { %2366 = vmatpush1.bf16.msra.mxu1 %v3502_v29  ;;  %2326 = vmatprep.subr.bf16.mxu0 %v3507_v30  ;;  %v3592_v29 = vld [vmem:[#allocation6 + $0x640] ss:$24 sps:$4 sm:$0xff]   ;;  %v3597_v30 = vld [vmem:[#allocation6 + $0x674] ss:$24 sps:$4 sm:$0xff]  }
 0x16a   : > { %2367 = vmatprep.subr.bf16.mxu1 %v3510_v31  ;;  %v3595_v31 = vld [vmem:[#allocation6 + $0x670] ss:$24 sps:$4 sm:$0xff]  }
 0x16c   : > { %2327 = vmatpush1.bf16.msra.mxu0 %v3505_v32  ;;  %v3600_v32 = vld [vmem:[#allocation6 + $0x6a4] ss:$24 sps:$4 sm:$0xff]  }
 0x16d   : > { %2368 = vmatpush1.bf16.msra.mxu1 %v3508_v33  ;;  %2328 = vmatprep.subr.bf16.mxu0 %v3513_v34  ;;  %v3598_v33 = vld [vmem:[#allocation6 + $0x6a0] ss:$24 sps:$4 sm:$0xff]   ;;  %v3603_v34 = vld [vmem:[#allocation6 + $0x6d4] ss:$24 sps:$4 sm:$0xff]  }
 0x16e   : > { %2369 = vmatprep.subr.bf16.mxu1 %v3516_v36  ;;  %v3601_v36 = vld [vmem:[#allocation6 + $0x6d0] ss:$24 sps:$4 sm:$0xff]  }
 0x170   : > { %2329 = vmatpush1.bf16.msra.mxu0 %v3511_v37  ;;  %v3609_v37 = vld [vmem:[#allocation6 + $0x734] ss:$24 sps:$4 sm:$0xff]  }
 0x171   : > { %2370 = vmatpush1.bf16.msra.mxu1 %v3514_v38  ;;  %2330 = vmatprep.subr.bf16.mxu0 %v3519_v39 }
 0x172   : > { %2371 = vmatprep.subr.bf16.mxu1 %v3522_v40 }
 0x174   : > { %2331 = vmatpush1.bf16.msra.mxu0 %v3517_v49 }
 0x175   : > { %2372 = vmatpush1.bf16.msra.mxu1 %v3520_v52  ;;  %2332 = vmatprep.subr.bf16.mxu0 %v3525_v41 }
 0x176   : > { %2373 = vmatprep.subr.bf16.mxu1 %v3528_v42  ;;  %v3607_v42 = vld [vmem:[#allocation6 + $0x730] ss:$24 sps:$4 sm:$0xff]  }
 0x178   : > { %2333 = vmatpush1.bf16.msra.mxu0 %v3523_v43 }
 0x179   : > { %2374 = vmatpush1.bf16.msra.mxu1 %v3526_v44  ;;  %2334 = vmatprep.subr.bf16.mxu0 %v3531_v45  ;;  %v3612_v45 = vld [vmem:[#allocation6 + $0x764] ss:$24 sps:$4 sm:$0xff]  }
 0x17a   : > { %2375 = vmatprep.subr.bf16.mxu1 %v3534_v46 }
 0x17c   : > { %2335 = vmatpush1.bf16.msra.mxu0 %v3529_v47  ;;  %v3610_v47 = vld [vmem:[#allocation6 + $0x760] ss:$24 sps:$4 sm:$0xff]  }
 0x17d   : > { %2376 = vmatpush1.bf16.msra.mxu1 %v3532_v48  ;;  %2336 = vmatprep.subr.bf16.mxu0 %v3537_v50  ;;  %v3615_v48 = vld [vmem:[#allocation6 + $0x794] ss:$24 sps:$4 sm:$0xff]   ;;  %v3613_v50 = vld [vmem:[#allocation6 + $0x790] ss:$24 sps:$4 sm:$0xff]  }
 0x17e   : > { %2377 = vmatprep.subr.bf16.mxu1 %v3540_v51  ;;  %v3618_v51 = vld [vmem:[#allocation6 + $0x7c4] ss:$24 sps:$4 sm:$0xff]  }
 0x180   : > { %2337 = vmatpush1.bf16.msra.mxu0 %v3535_v53  ;;  %v3616_v53 = vld [vmem:[#allocation6 + $0x7c0] ss:$24 sps:$4 sm:$0xff]  }
 0x181   : > { %2378 = vmatpush1.bf16.msra.mxu1 %v3538_v54  ;;  %2338 = vmatprep.subr.bf16.mxu0 %v3543_v55  ;;  %v3621_v54 = vld [vmem:[#allocation6 + $0x7f4] ss:$24 sps:$4 sm:$0xff]   ;;  %v3619_v55 = vld [vmem:[#allocation6 + $0x7f0] ss:$24 sps:$4 sm:$0xff]  }
 0x182   : > { %2379 = vmatprep.subr.bf16.mxu1 %v3546_v56  ;;  %v3624_v56 = vld [vmem:[#allocation6 + $0x824] ss:$24 sps:$4 sm:$0xff]  }
 0x184   : > { %2339 = vmatpush1.bf16.msra.mxu0 %v3541_v57  ;;  %v3622_v57 = vld [vmem:[#allocation6 + $0x820] ss:$24 sps:$4 sm:$0xff]  }
 0x185   : > { %2380 = vmatpush1.bf16.msra.mxu1 %v3544_v58  ;;  %2340 = vmatprep.subr.bf16.mxu0 %v3549_v59  ;;  %v3627_v58 = vld [vmem:[#allocation6 + $0x854] ss:$24 sps:$4 sm:$0xff]   ;;  %v3625_v59 = vld [vmem:[#allocation6 + $0x850] ss:$24 sps:$4 sm:$0xff]  }
 0x186   : > { %2381 = vmatprep.subr.bf16.mxu1 %v3552_v60  ;;  %v3630_v60 = vld [vmem:[#allocation6 + $0x884] ss:$24 sps:$4 sm:$0xff]  }
 0x188   : > { %2341 = vmatpush1.bf16.msra.mxu0 %v3547_v61  ;;  %v3628_v61 = vld [vmem:[#allocation6 + $0x880] ss:$24 sps:$4 sm:$0xff]  }
 0x189   : > { %2382 = vmatpush1.bf16.msra.mxu1 %v3550_v62  ;;  %2342 = vmatprep.subr.bf16.mxu0 %v3555_v63  ;;  %v3633_v62 = vld [vmem:[#allocation6 + $0x8b4] ss:$24 sps:$4 sm:$0xff]   ;;  %v3631_v63 = vld [vmem:[#allocation6 + $0x8b0] ss:$24 sps:$4 sm:$0xff]  }
 0x18a   : > { %2383 = vmatprep.subr.bf16.mxu1 %v3558_v0  ;;  %v3636_v0 = vld [vmem:[#allocation6 + $0x8e4] ss:$24 sps:$4 sm:$0xff]  }
 0x18c   : > { %2343 = vmatpush1.bf16.msra.mxu0 %v3553_v1  ;;  %v3634_v1 = vld [vmem:[#allocation6 + $0x8e0] ss:$24 sps:$4 sm:$0xff]  }
 0x18d   : > { %2384 = vmatpush1.bf16.msra.mxu1 %v3556_v2  ;;  %2344 = vmatprep.subr.bf16.mxu0 %v3561_v3 }
 0x18e   : > { %2385 = vmatprep.subr.bf16.mxu1 %v3564_v4 }
 0x190   : > { %2345 = vmatpush1.bf16.msra.mxu0 %v3559_v5 }
 0x191   : > { %2386 = vmatpush1.bf16.msra.mxu1 %v3562_v6  ;;  %2346 = vmatprep.subr.bf16.mxu0 %v3567_v7 }
 0x192   : > { %2387 = vmatprep.subr.bf16.mxu1 %v3570_v10 }
 0x194   : > { %2347 = vmatpush1.bf16.msra.mxu0 %v3565_v11 }
 0x195   : > { %2388 = vmatpush1.bf16.msra.mxu1 %v3568_v12  ;;  %2348 = vmatprep.subr.bf16.mxu0 %v3573_v13 }
 0x196   : > { %2389 = vmatprep.subr.bf16.mxu1 %v3576_v14 }
 0x198   : > { %2349 = vmatpush1.bf16.msra.mxu0 %v3571_v15 }
 0x199   : > { %2390 = vmatpush1.bf16.msra.mxu1 %v3574_v16  ;;  %2350 = vmatprep.subr.bf16.mxu0 %v3579_v18 }
 0x19a   : > { %2391 = vmatprep.subr.bf16.mxu1 %v3582_v19 }
 0x19c   : > { %2351 = vmatpush1.bf16.msra.mxu0 %v3577_v20 }
 0x19d   : > { %2392 = vmatpush1.bf16.msra.mxu1 %v3580_v21  ;;  %2352 = vmatprep.subr.bf16.mxu0 %v3585_v22 }
 0x19e   : > { %2393 = vmatprep.subr.bf16.mxu1 %v3588_v23 }
 0x1a0   : > { %2353 = vmatpush1.bf16.msra.mxu0 %v3583_v24 }
 0x1a1   : > { %2394 = vmatpush1.bf16.msra.mxu1 %v3586_v25  ;;  %2404 = vmatprep.subr.bf16.mxu0 %v3591_v26 }
 0x1a3   : > { %2355 = vmatmul.mubr.bf16.vlgmr.msra.gmra.mrb[12].mxu0 %v4179_v8  ;;  %v3606_v8 = vld [vmem:[#allocation6 + $0x704] ss:$24 sps:$4 sm:$0xff]  }
 0x1a4   : > { %2396 = vmatmul.mubr.bf16.vlgmr.msra.gmra.mrb[12].mxu1 %v4181_v9  ;;  %2405 = vmatpush1.bf16.msra.mxu0 %v3589_v27  ;;  %v3604_v9 = vld [vmem:[#allocation6 + $0x700] ss:$24 sps:$4 sm:$0xff]  }
 0x1a5   : > { %2436 = vmatprep.mubr.bf16.mxu0 %v4187_v35  ;;  %2406 = vmatprep.subr.bf16.mxu0 %v3594_v28 }
 0x1a8   : > { %2407 = vmatpush1.bf16.msra.mxu0 %v3592_v29 }
 0x1a9   : > { %2408 = vmatprep.subr.bf16.mxu0 %v3597_v30 }
 0x1ac   : > { %2409 = vmatpush1.bf16.msra.mxu0 %v3595_v31 }
 0x1ad   : > { %2410 = vmatprep.subr.bf16.mxu0 %v3600_v32 }
 0x1b0   : > { %2411 = vmatpush1.bf16.msra.mxu0 %v3598_v33 }
 0x1b1   : > { %2412 = vmatprep.subr.bf16.mxu0 %v3603_v34 }
 0x1b4   : > { %2413 = vmatpush1.bf16.msra.mxu0 %v3601_v36 }
 0x1b5   : > { %2414 = vmatprep.subr.bf16.mxu0 %v3606_v8  ;;  %v2468_v8 = vlaneseq }
 0x1b6   : > { %v2110_v38 = vpop.f32.mrb[0].mxu0 }
 0x1b7   : > { %v2151_v35 = vpop.f32.mrb[0].mxu1  ;;  %v2112_v40 = vpop.f32.mrb[1].mxu0 }
 0x1b8   : > { %v2152_v39 = vadd.f32 %v2151_v35, %v2110_v38  ;;  %v2153_v49 = vpop.f32.mrb[1].mxu1  ;;  %v2114_v41 = vpop.f32.mrb[2].mxu0  ;;  %2415 = vmatpush1.bf16.msra.mxu0 %v3604_v9  ;;  %v2469_v9 = vshrl.u32 %v2468_v8, 7  ;;  %v2466_v38 = vld [vmem:[#allocation8] sm:$0x3f] }
 0x1b9   : > { %v2154_v52 = vadd.f32 %v2153_v49, %v2112_v40  ;;  %v2155_v43 = vpop.f32.mrb[2].mxu1  ;;  %v2115_v44 = vpop.f32.mrb[3].mxu0  ;;  %2416 = vmatprep.subr.bf16.mxu0 %v3609_v37 }
 0x1ba   : > { %v2156_v46 = vpop.f32.mrb[3].mxu1  ;;  %v4205_v37 = vsub.s32 0, %v2469_v9  ;;  %v4207_v35 = vsub.s32 1, %v2469_v9  ;;  %v4214_v41 = vsub.s32 3, %v2469_v9 }
 0x1bc   : > { %2417 = vmatpush1.bf16.msra.mxu0 %v3607_v42  ;;  %v2471_v40 = vrot.slane %v2466_v38, %v4205_v37  ;;  %v2475_v49 = vrot.slane %v2466_v38, %v4207_v35 }
 0x1bd   : > { %2418 = vmatprep.subr.bf16.mxu0 %v3612_v45  ;;  %v2483_v45 = vrot.slane %v2466_v38, %v4214_v41 }
 0x1c0   : > { %2419 = vmatpush1.bf16.msra.mxu0 %v3610_v47 }
 0x1c1   : > { %2420 = vmatprep.subr.bf16.mxu0 %v3615_v48 }
 0x1c4   : > { %2421 = vmatpush1.bf16.msra.mxu0 %v3613_v50 }
 0x1c5   : > { %2422 = vmatprep.subr.bf16.mxu0 %v3618_v51 }
 0x1c8   : > { %2423 = vmatpush1.bf16.msra.mxu0 %v3616_v53  ;;  %v4217_v53 = vsub.s32 4, %v2469_v9 }
 0x1c9   : > { %2424 = vmatprep.subr.bf16.mxu0 %v3621_v54  ;;  %v4219_v54 = vsub.s32 5, %v2469_v9 }
 0x1cc   : > { %2425 = vmatpush1.bf16.msra.mxu0 %v3619_v55  ;;  %v2487_v55 = vrot.slane %v2466_v38, %v4217_v53 }
 0x1cd   : > { %2426 = vmatprep.subr.bf16.mxu0 %v3624_v56 }
 0x1d0   : > { %2427 = vmatpush1.bf16.msra.mxu0 %v3622_v57 }
 0x1d1   : > { %2428 = vmatprep.subr.bf16.mxu0 %v3627_v58  ;;  %v2491_v58 = vrot.slane %v2466_v38, %v4219_v54 }
 0x1d4   : > { %2429 = vmatpush1.bf16.msra.mxu0 %v3625_v59 }
 0x1d5   : > { %2430 = vmatprep.subr.bf16.mxu0 %v3630_v60 }
 0x1d8   : > { %2431 = vmatpush1.bf16.msra.mxu0 %v3628_v61 }
 0x1d9   : > { %2432 = vmatprep.subr.bf16.mxu0 %v3633_v62 }
 0x1dc   : > { %2433 = vmatpush1.bf16.msra.mxu0 %v3631_v63 }
 0x1dd   : > { %2434 = vmatprep.subr.bf16.mxu0 %v3636_v0 }
 0x1e0   : > { %2435 = vmatpush1.bf16.msra.mxu0 %v3634_v1 }
 0x1e3   : > { %2437 = vmatmul.mubr.bf16.vlgmr.msra.gmra.mrb[16].mxu0 %v4191_v17 }
 0x1f6   : > { %v2192_v2 = vpop.f32.mrb[4].mxu0 }
 0x1f7   : > { %v2233_v3 = vpop.f32.mrb[4].mxu1  ;;  %v2193_v4 = vadd.f32 %v2192_v2, %v2152_v39  ;;  %v2194_v5 = vpop.f32.mrb[5].mxu0  ;;  %v4209_v39 = vsub.s32 2, %v2469_v9 }
 0x1f8   : > { %v2235_v6 = vpop.f32.mrb[5].mxu1  ;;  %v2195_v7 = vadd.f32 %v2194_v5, %v2154_v52  ;;  %v2196_v10 = vpop.f32.mrb[6].mxu0 }
 0x1f9   : > { %v2237_v11 = vpop.f32.mrb[6].mxu1  ;;  %v2197_v12 = vpop.f32.mrb[7].mxu0  ;;  %v2479_v52 = vrot.slane %v2466_v38, %v4209_v39  ;;  %v2498_v42 = vadd.f32 %v2471_v40, %v2193_v4 }
 0x1fa   : > { %v2238_v13 = vpop.f32.mrb[7].mxu1  ;;  %v2499_v43 = vadd.f32 %v2475_v49, %v2195_v7 }
 0x1fb   : > { %v2510_v46 = vmul.f32 0.70710677, %v2498_v42  ;;  %v2504_v7 = vmul.f32 0.5, %v2498_v42 }
 0x1fc   : > { %v2511_v47 = vmul.f32 0.70710677, %v2499_v43  ;;  %v2505_v10 = vmul.f32 0.5, %v2499_v43 }
 0x1fd   : > { %3637 = verf.f32 %v2510_v46 }
 0x1fe   : > { %3639 = verf.f32 %v2511_v47 }
 0x207   : > { %v3638_v56 = vpop.eup %3637 }
 0x208   : > { %v3640_v59 = vpop.eup %3639 }
 0x209   : > { %v2523_v4 = vadd.f32 1.0, %v3640_v59 }
 0x236   : > { %v2274_v14 = vpop.f32.mrb[8].mxu0 }
 0x237   : > { %v2315_v15 = vpop.f32.mrb[8].mxu1  ;;  %v2275_v16 = vadd.f32 %v2274_v14, %v2233_v3  ;;  %v2276_v18 = vpop.f32.mrb[9].mxu0  ;;  %v2522_v3 = vadd.f32 1.0, %v3638_v56 }
 0x238   : > { %v2317_v19 = vpop.f32.mrb[9].mxu1  ;;  %v2277_v20 = vadd.f32 %v2276_v18, %v2235_v6  ;;  %v2278_v21 = vpop.f32.mrb[10].mxu0 }
 0x239   : > { %v2319_v22 = vpop.f32.mrb[10].mxu1  ;;  %v2316_v23 = vadd.f32 %v2315_v15, %v2275_v16  ;;  %v2279_v17 = vpop.f32.mrb[11].mxu0  ;;  %v4223_v14 = vmul.f32 %v2522_v3, %v2504_v7  ;;  %v4225_v15 = vmul.f32 %v2523_v4, %v2505_v10 }
 0x23a   : > { %v2320_v24 = vpop.f32.mrb[11].mxu1  ;;  %v2318_v25 = vadd.f32 %v2317_v19, %v2277_v20 }
 0x23b   : > { %v2500_v44 = vadd.f32 %v2479_v52, %v2316_v23  ;;  %v2541_v20 = vmul.f32 %v4223_v14, %v4223_v14  ;;  %v2542_v21 = vmul.f32 %v4225_v15, %v4225_v15  ;;  %v2534_v17 = vadd.f32 %v4225_v15, %v4223_v14 }
 0x23c   : > { %v2501_v50 = vadd.f32 %v2483_v45, %v2318_v25 }
 0x23d   : > { %v2512_v48 = vmul.f32 0.70710677, %v2500_v44  ;;  %v2506_v16 = vmul.f32 0.5, %v2500_v44 }
 0x23e   : > { %v2513_v51 = vmul.f32 0.70710677, %v2501_v50  ;;  %v2507_v22 = vmul.f32 0.5, %v2501_v50 }
 0x23f   : > { %3641 = verf.f32 %v2512_v48 }
 0x240   : > { %3643 = verf.f32 %v2513_v51 }
 0x249   : > { %v3642_v0 = vpop.eup %3641 }
 0x24a   : > { %v2524_v11 = vadd.f32 1.0, %v3642_v0  ;;  %v3644_v13 = vpop.eup %3643 }
 0x24b   : > { %v2525_v19 = vadd.f32 1.0, %v3644_v13 }
 0x24c   : > { %v2530_v18 = vmul.f32 %v2524_v11, %v2506_v16 }
 0x24d   : > { %v2531_v23 = vmul.f32 %v2525_v19, %v2507_v22 }
 0x24e   : > { %v2543_v24 = vmul.f32 %v2530_v18, %v2530_v18  ;;  %v2535_v25 = vadd.f32 %v2534_v17, %v2530_v18 }
 0x250   : > { %v2536_v8 = vadd.f32 %v2535_v25, %v2531_v23 }
 0x276   : > { %v2356_v26 = vpop.f32.mrb[12].mxu0 }
 0x277   : > { %v2397_v27 = vpop.f32.mrb[12].mxu1  ;;  %v2358_v29 = vpop.f32.mrb[13].mxu0 }
 0x278   : > { %v2398_v28 = vadd.f32 %v2397_v27, %v2356_v26  ;;  %v2399_v30 = vpop.f32.mrb[13].mxu1  ;;  %v2360_v32 = vpop.f32.mrb[14].mxu0  ;;  %v2547_v26 = vadd.f32 %v2542_v21, %v2541_v20 }
 0x279   : > { %v2400_v31 = vadd.f32 %v2399_v30, %v2358_v29  ;;  %v2401_v33 = vpop.f32.mrb[14].mxu1  ;;  %v2361_v34 = vpop.f32.mrb[15].mxu0 }
 0x27a   : > { %v2402_v36 = vpop.f32.mrb[15].mxu1  ;;  %v2548_v32 = vadd.f32 %v2547_v26, %v2543_v24 }
 0x2b6   : > { %v2438_v57 = vpop.f32.mrb[16].mxu0 }
 0x2b7   : > { %v2439_v60 = vadd.f32 %v2438_v57, %v2398_v28  ;;  %v2440_v61 = vpop.f32.mrb[17].mxu0  ;;  %v2573_v57 = vld [vmem:[#allocation9] sm:$0x3f] }
 0x2b8   : > { %v2441_v62 = vadd.f32 %v2440_v61, %v2400_v31  ;;  %v2442_v63 = vpop.f32.mrb[18].mxu0  ;;  %v2544_v31 = vmul.f32 %v2531_v23, %v2531_v23  ;;  %v2578_v59 = vrot.slane %v2573_v57, %v4205_v37  ;;  %v2582_v61 = vrot.slane %v2573_v57, %v4207_v35 }
 0x2b9   : > { %v2502_v1 = vadd.f32 %v2487_v55, %v2439_v60  ;;  %v2443_v2 = vpop.f32.mrb[19].mxu0  ;;  %v2586_v63 = vrot.slane %v2573_v57, %v4209_v39  ;;  %v2594_v7 = vrot.slane %v2573_v57, %v4217_v53 }
 0x2ba   : > { %v2503_v5 = vadd.f32 %v2491_v58, %v2441_v62  ;;  %v2549_v49 = vadd.f32 %v2548_v32, %v2544_v31  ;;  %v2611_v58 = vld [vmem:[#allocation11] sm:$0x3f] }
 0x2bb   : > { %v2514_v6 = vmul.f32 0.70710677, %v2502_v1  ;;  %v2508_v29 = vmul.f32 0.5, %v2502_v1  ;;  %v2616_v60 = vrot.slane %v2611_v58, %v4205_v37  ;;  %v2620_v62 = vrot.slane %v2611_v58, %v4207_v35 }
 0x2bc   : > { %v2515_v12 = vmul.f32 0.70710677, %v2503_v5  ;;  %v2509_v33 = vmul.f32 0.5, %v2503_v5  ;;  %v2624_v0 = vrot.slane %v2611_v58, %v4209_v39  ;;  %v2590_v1 = vrot.slane %v2573_v57, %v4214_v41 }
 0x2bd   : > { %3645 = verf.f32 %v2514_v6  ;;  %v2628_v2 = vrot.slane %v2611_v58, %v4214_v41  ;;  %v2598_v35 = vrot.slane %v2573_v57, %v4219_v54  ;;  %v2632_v41 = vrot.slane %v2611_v58, %v4217_v53 }
 0x2be   : > { %3647 = verf.f32 %v2515_v12 }
 0x2c7   : > { %v3646_v27 = vpop.eup %3645 }
 0x2c8   : > { %v3648_v28 = vpop.eup %3647  ;;  %v2526_v30 = vadd.f32 1.0, %v3646_v27 }
 0x2c9   : > { %v2527_v34 = vadd.f32 1.0, %v3648_v28 }
 0x2ca   : > { %v2532_v36 = vmul.f32 %v2526_v30, %v2508_v29 }
 0x2cb   : > { %v2533_v9 = vmul.f32 %v2527_v34, %v2509_v33 }
 0x2cc   : > { %v2537_v38 = vadd.f32 %v2536_v8, %v2532_v36  ;;  %v2545_v40 = vmul.f32 %v2532_v36, %v2532_v36 }
 0x2cd   : > { %v2546_v42 = vmul.f32 %v2533_v9, %v2533_v9 }
 0x2ce   : > { %v2538_v52 = vadd.f32 %v2537_v38, %v2533_v9  ;;  %v2550_v43 = vadd.f32 %v2549_v49, %v2545_v40 }
 0x2d0   : > { %2539 = vadd.xlane.f32.xlu0 %v2538_v52  ;;  %v2551_v44 = vadd.f32 %v2550_v43, %v2546_v42 }
 0x2d4   : > { %2552 = vadd.xlane.f32.xlu0 %v2551_v44 }
 0x35d   : > { %v2540_v45 = vpop.xlane.xlu0 %2539 }
 0x35e   : > { %v2554_v46 = vmul.f32 0.0013020834, %v2540_v45 }
 0x360   : > { %v2556_v48 = vmul.f32 %v2554_v46, %v2554_v46  ;;  %v2559_v3 = vsub.f32 %v4223_v14, %v2554_v46  ;;  %v2560_v4 = vsub.f32 %v4225_v15, %v2554_v46  ;;  %v2561_v5 = vsub.f32 %v2530_v18, %v2554_v46 }
 0x361   : > { %v2553_v47 = vpop.xlane.xlu0 %2552  ;;  %v2562_v6 = vsub.f32 %v2531_v23, %v2554_v46  ;;  %v2563_v10 = vsub.f32 %v2532_v36, %v2554_v46  ;;  %v2564_v11 = vsub.f32 %v2533_v9, %v2554_v46  ;;  %v2636_v14 = vrot.slane %v2611_v58, %v4219_v54 }
 0x362   : > { %v2555_v50 = vmul.f32 0.0013020834, %v2553_v47 }
 0x364   : > { %v2557_v51 = vsub.f32 %v2555_v50, %v2556_v48 }
 0x366   : > { %v2558_v55 = vmax.f32 %v2557_v51, 0.0 }
 0x368   : > { %v2565_v56 = vadd.f32 1e-12, %v2558_v55 }
 0x36a   : > { %3649 = vrsqrt.f32 %v2565_v56 }
 0x374   : > { %v3650_v37 = vpop.eup %3649 }
 0x375   : > { %v2567_v39 = vmul.f32 %v3650_v37, %v2559_v3  ;;  %v2568_v12 = vmul.f32 %v3650_v37, %v2560_v4  ;;  %v2569_v13 = vmul.f32 %v3650_v37, %v2561_v5  ;;  %v2570_v16 = vmul.f32 %v3650_v37, %v2562_v6 }
 0x376   : > { %v2571_v15 = vmul.f32 %v3650_v37, %v2563_v10  ;;  %v2572_v19 = vmul.f32 %v3650_v37, %v2564_v11 }
 0x377   : > { %v2605_v18 = vmul.f32 %v2578_v59, %v2567_v39  ;;  %v2606_v20 = vmul.f32 %v2582_v61, %v2568_v12  ;;  %v2607_v21 = vmul.f32 %v2586_v63, %v2569_v13  ;;  %v2608_v22 = vmul.f32 %v2590_v1, %v2570_v16 }
 0x378   : > { %v2609_v23 = vmul.f32 %v2594_v7, %v2571_v15  ;;  %v2610_v17 = vmul.f32 %v2598_v35, %v2572_v19 }
 0x379   : > { %v2643_v24 = vadd.f32 %v2616_v60, %v2605_v18  ;;  %v2644_v25 = vadd.f32 %v2620_v62, %v2606_v20  ;;  %v2645_v26 = vadd.f32 %v2624_v0, %v2607_v21  ;;  %v2646_v53 = vadd.f32 %v2628_v2, %v2608_v22 }
 0x37a   : > { %v2647_v27 = vadd.f32 %v2632_v41, %v2609_v23  ;;  %v2648_v54 = vadd.f32 %v2636_v14, %v2610_v17 }
 0x37b   : > { %2649 = vst [vmem:[%s317_s26] sm:$0xff] %v2643_v24  ;;  %2650 = vst [vmem:[%s317_s26 + $0x8] sm:$0xff] %v2644_v25 }
 0x37c   : > { %2651 = vst [vmem:[%s317_s26 + $0x10] sm:$0xff] %v2645_v26  ;;  %2652 = vst [vmem:[%s317_s26 + $0x18] sm:$0xff] %v2646_v53 }
 0x37d   : > { %2653 = vst [vmem:[%s317_s26 + $0x20] sm:$0xff] %v2647_v27  ;;  %2654 = vst [vmem:[%s317_s26 + $0x28] sm:$0xff] %v2648_v54 }
 0x37e   : > { %3806 = shalt.err (!%p3803_p8)
}
 0x37f   : > { %s3807_s16 = scalar_lea.hbm %s4253_s21, 768  ;;  %s3811_s28 = scalar_lea.hbm %s4307_s5, 1536 }
 0x380   : > { %p3808_p1 = scmp.ne.s32.totalorder %s4253_s21, %s3807_s16  ;;  %p3812_p13 = scmp.lt.u32.totalorder %s4253_s21, %s4307_s5 }
 0x381   : > { %p3813_p3 = scmp.lt.u32.totalorder %s3811_s28, %s3807_s16  ;;  %p3815_p2 = scmp.lt.u32.totalorder %s3807_s16, %s4253_s21 }
 0x382   : > { %p3809_p12 = pnand %p3808_p1, %p4326_p9 }
 0x383   : > { %p3814_p4 = por %p3813_p3, %p3812_p13 }
 0x384   : > { %p3810_p6 = pneg %p3809_p12 }
 0x385   : > { %p3816_p10 = por %p3815_p2, %p3814_p4 }
 0x387   : > { %p3817_p11 = pnand %p3816_p10, %p3810_p6 }
 0x389   : > { %3820 = shalt.err (!%p3817_p11)
}
 0x38a   : > { %3118 = dma.vmem_to_hbm [thread:$0]  (%p4326_p9), %s4255_s27, 768, %s4253_s21, %s2656_s14  }
 0x38b PF: > { %s2682_s25 = sand.u32 1, %s3863_s18   ;;  %p4327_p0 = scmp.ne.s32.totalorder %s4322_s9, 0 }
 0x38c   : > { %p4328_p7 = scmp.ge.s32.totalorder %s3883_s23, 2  ;;  %s2683_s26 = scalar_lea.sflag [#allocation5], %s2682_s25 }
 0x38e   : > { %p3138_p5 = pnand %p4328_p7, %p4327_p0 }
 0x390   : > { %3858 = dma.done.wait (!%p3138_p5), %s2683_s26, 768  }
 0x391   : > { %3860 = vsyncadd (!%p3138_p5), %s2683_s26, 4294966528  ;;  %s23_s23 = sadd.s32 1, %s3883_s23   ;;  %s4329_s18 = smov %s3867_s19 }
 0x392   : > { %p20_p8 = scmp.ge.s32.totalorder %s23_s23, 4   ;;  %s4330_s19 = smov %s3871_s20 }
 0x393   : > { %s4331_s20 = smov %s4099_s7  ;;  %s4332_s21 = smov %s3879_s22 }
 0x394   : > { %s4333_s22 = smov %s4335_s6  ;;  %22 = sbr.rel (!%p20_p8) target bundleno = 10 (0xa), region = 110 }
 0x39b   :  { %2688 = vsyncpa [#allocation4], 1 }
 0x39c   :  { %2690 = vsyncpa [#allocation4 + $0x1], 1 }
 0x39d   :  { %2691 = vsyncpa [#allocation7], 1 }
 0x39e   :  { %2692 = vsyncpa [#allocation10], 1 }
 0x39f   :  { %2693 = vsyncpa [#allocation5], 1 }
 0x3a0   :  { %2695 = vsyncpa [#allocation5 + $0x1], 1 }

</bundles_post_ra>
